<compile_context>
chip_gen: v5e
topology: v5e:2x2
jax: 0.10.0
libtpu: 0.0.40
codegen_flags: <defaults>
</compile_context>

<pallas_src>
import functools
import numpy as np
import jax
import jax.numpy as jnp
from jax.experimental import pallas as pl
from jax.experimental.pallas import tpu as pltpu

# ----------------------------- model config ---------------------------------
LAT_DIM = 16
HIDDEN_DIM = 32
INPUT_DIM = 3
NLAYERS = 8
OUT_DIM = 1
RADIUS_INIT = 1.0
BETA = 100.0
SP_THRESHOLD = 20.0          # PyTorch Softplus default threshold
D_IN = LAT_DIM + INPUT_DIM   # 19
SKIP_LAYER = NLAYERS // 2    # 4
SQRT2_INV = 1.0 / np.sqrt(2.0)


def _softplus(x):
    # Matches torch.nn.Softplus(beta=100): linear above threshold.
    bx = x * BETA
    safe = jnp.minimum(bx, SP_THRESHOLD)
    return jnp.where(bx > SP_THRESHOLD, x, jnp.log1p(jnp.exp(safe)) / BETA)


def _round_up(x, m):
    return ((x + m - 1) // m) * m


# ------------------------------ Pallas kernel --------------------------------
def geo_mlp_kernel(xyz_ref, b0e_ref, b4e_ref, w0x_ref, w4x_ref,
                   wh_ref, bh_ref, w8_ref, b8_ref, sdf_ref):
    """Transposed layout: features on sublanes, points on lanes.

    xyz_ref : (1, 3, tm)    tile of transposed/padded xyz
    b0e_ref : (1, H, 1)     bias of layer 0 with W0_lat @ lat folded in
    b4e_ref : (1, H, 1)     bias of layer 4 with (W4_lat @ lat)/sqrt(2) folded in
    w0x_ref : (H, 3)        layer-0 weight columns acting on xyz
    w4x_ref : (H, 3)        layer-4 (skip) weight columns acting on xyz
    wh_ref  : (7, H, H)     hidden weights for layers 1,2,3,4(h-part),5,6,7
    bh_ref  : (6, H, 1)     biases for layers 1,2,3,5,6,7
    w8_ref  : (1, H)        final layer weight
    b8_ref  : (1, 1)        final layer bias
    sdf_ref : (1, 1, tm)    output tile
    """
    dot = functools.partial(jnp.dot, preferred_element_type=jnp.float32)

    xyz = xyz_ref[0]           # (3, tm) — points on the lane axis
    b0 = b0e_ref[0]            # (H, 1)
    b4 = b4e_ref[0]            # (H, 1)

    x = _softplus(dot(w0x_ref[...], xyz) + b0)                    # layer 0
    x = _softplus(dot(wh_ref[0], x) + bh_ref[0])                  # layer 1
    x = _softplus(dot(wh_ref[1], x) + bh_ref[1])                  # layer 2
    x = _softplus(dot(wh_ref[2], x) + bh_ref[2])                  # layer 3
    # layer 4 (skip): (W4h @ x + W4x @ xyz + W4l @ lat)/sqrt(2) + b4
    #                 with the lat term pre-folded into b4_eff.
    x = _softplus((dot(wh_ref[3], x) + dot(w4x_ref[...], xyz)) * SQRT2_INV + b4)
    x = _softplus(dot(wh_ref[4], x) + bh_ref[3])                  # layer 5
    x = _softplus(dot(wh_ref[5], x) + bh_ref[4])                  # layer 6
    x = _softplus(dot(wh_ref[6], x) + bh_ref[5])                  # layer 7
    # layer 8: final linear, no activation (lane-dense (1, tm) store)
    sdf_ref[0] = (dot(w8_ref[...], x) + b8_ref[...]).astype(sdf_ref.dtype)


# ------------------------------ wrapper --------------------------------------
def geo_mlp_sdf_pallas(xyz, lat_b, params, *, tm=512):
    """xyz: (B, N, 3) f32; lat_b: (B, LAT_DIM) f32 (one latent per batch).
    params: list of 9 (w, b) with PyTorch layout w=(out, in), b=(out,)."""
    B, N, _ = xyz.shape
    H = HIDDEN_DIM

    tm_eff = min(tm, _round_up(N, 128))
    n_pad = _round_up(N, tm_eff)

    # points on the lane axis, padded to a 128-multiple tile
    xyz_t = jnp.transpose(xyz.astype(jnp.float32), (0, 2, 1))     # (B, 3, N)
    if n_pad != N:
        xyz_t = jnp.pad(xyz_t, ((0, 0), (0, 0), (0, n_pad - N)))

    w0, b0 = params[0]
    w4, b4 = params[SKIP_LAYER]
    w8, b8 = params[-1]
    w0x, w0l = w0[:, :INPUT_DIM], w0[:, INPUT_DIM:]
    w4h = w4[:, :H]
    w4x = w4[:, H:H + INPUT_DIM]
    w4l = w4[:, H + INPUT_DIM:]

    # fold the batch-constant latent contributions into per-batch biases
    lat_b = lat_b.astype(jnp.float32)
    b0_eff = (b0[None, :] + lat_b @ w0l.T).reshape(B, H, 1)
    b4_eff = (b4[None, :] + (lat_b @ w4l.T) * SQRT2_INV).reshape(B, H, 1)

    # pack the hidden weights / biases into resident VMEM slabs
    w_hid = jnp.stack([params[1][0], params[2][0], params[3][0], w4h,
                       params[5][0], params[6][0], params[7][0]])  # (7, H, H)
    b_hid = jnp.stack([params[i][1]
                       for i in (1, 2, 3, 5, 6, 7)]).reshape(6, H, 1)
    w8 = w8.reshape(OUT_DIM, H)
    b8 = b8.reshape(OUT_DIM, 1)

    full = lambda a: pl.BlockSpec(a.shape, lambda b_, j: (0,) * a.ndim)

    sdf = pl.pallas_call(
        geo_mlp_kernel,
        out_shape=jax.ShapeDtypeStruct((B, OUT_DIM, n_pad), jnp.float32),
        grid=(B, n_pad // tm_eff),
        in_specs=[
            pl.BlockSpec((1, INPUT_DIM, tm_eff), lambda b_, j: (b_, 0, j)),
            pl.BlockSpec((1, H, 1), lambda b_, j: (b_, 0, 0)),
            pl.BlockSpec((1, H, 1), lambda b_, j: (b_, 0, 0)),
            full(w0x), full(w4x), full(w_hid), full(b_hid), full(w8), full(b8),
        ],
        out_specs=pl.BlockSpec((1, OUT_DIM, tm_eff), lambda b_, j: (b_, 0, j)),
        compiler_params=pltpu.CompilerParams(
            dimension_semantics=("parallel", "parallel")),
    )(xyz_t, b0_eff, b4_eff, w0x, w4x, w_hid, b_hid, w8, b8)

    sdf = sdf[:, :, :N]                     # drop padded points  (B, 1, N)
    return sdf.reshape(B, N, OUT_DIM)       # middle dim is 1 -> pure reshape


def global_field_forward(in_dict, params, *, tm=512):
    """Mirrors GlobalFieldNew.forward for the default configuration."""
    xyz = in_dict['queries_can']            # (B, N, 3)
    lat_rep = in_dict['cond']['geo']        # (B, 1, lat_dim)
    if lat_rep.shape[1] != 1:
        # TODO(synk): per-point latent codes (lat_rep.shape[1] == N) are not
        # supported by the fused (lat folded into biases) kernel path.
        raise NotImplementedError("per-point lat_rep not supported")
    lat_b = lat_rep[:, 0, :]                # (B, lat_dim)
    sdf = geo_mlp_sdf_pallas(xyz, lat_b, params, tm=tm)
    # TODO(synk): color_branch / uv_communication / include_anchors heads are
    # inactive under the default constructor flags and are not implemented;
    # last_feats is discarded by GlobalFieldNew, so its HBM writeback is omitted.
    return {'sdf': sdf, 'anchors': None}


# ------------------------- deterministic parameter init ----------------------
def init_geo_mlp_params(key):
    """PyTorch-layout params: w = (out_features, in_features), b = (out_features,)."""
    dims = [D_IN] + [HIDDEN_DIM] * NLAYERS + [OUT_DIM]
    num_layers = len(dims)  # 10
    params = []
    for layer in range(num_layers - 1):
        in_dim = dims[layer] + (D_IN if layer == SKIP_LAYER else 0)
        out_dim = dims[layer + 1]
        key, k1, k2 = jax.random.split(key, 3)
        if layer == num_layers - 2:
            # geometric init: weight ~ N(sqrt(pi)/sqrt(hidden), 1e-5), bias = -radius
            mean = np.sqrt(np.pi) / np.sqrt(dims[layer])
            w = mean + 1e-5 * jax.random.normal(k1, (out_dim, in_dim), jnp.float32)
            b = jnp.full((out_dim,), -RADIUS_INIT, jnp.float32)
        else:
            bound = 1.0 / np.sqrt(in_dim)
            w = jax.random.uniform(k1, (out_dim, in_dim), jnp.float32, -bound, bound)
            b = jax.random.uniform(k2, (out_dim,), jnp.float32, -bound, bound)
        params.append((w, b))
    return params


# ------------------------------ pure-JAX reference ----------------------------
def geo_mlp_ref(inp_flat, params):
    x = inp_flat
    for layer, (w, b) in enumerate(params):
        if layer == SKIP_LAYER:
            x = jnp.concatenate([x, inp_flat], axis=-1) / np.sqrt(2.0)
        x = x @ w.T + b
        if layer < len(params) - 1:
            x = _softplus(x)
    return x


# ----------------------------------- main -------------------------------------
if __name__ == "__main__":
    key = jax.random.PRNGKey(0)
    k_params, k_xyz, k_lat = jax.random.split(key, 3)

    B, N = 2, 200   # ragged N exercises the pad/slice path
    params = init_geo_mlp_params(k_params)
    xyz = jax.random.normal(k_xyz, (B, N, INPUT_DIM), jnp.float32)
    lat_geo = 0.1 * jax.random.normal(k_lat, (B, 1, LAT_DIM), jnp.float32)

    in_dict = {'queries_can': xyz, 'cond': {'geo': lat_geo}}
    out = global_field_forward(in_dict, params)
    sdf = jax.block_until_ready(out['sdf'])

    # correctness check against a pure-JAX reference of the full geo_mlp
    lat_full = jnp.broadcast_to(lat_geo, (B, N, LAT_DIM))
    inp_flat = jnp.concatenate([xyz, lat_full], -1).reshape(B * N, D_IN)
    sdf_ref = geo_mlp_ref(inp_flat, params)
    np.testing.assert_allclose(np.asarray(sdf).reshape(-1, OUT_DIM),
                               np.asarray(sdf_ref), rtol=2e-4, atol=2e-4)

    print("KERNEL_OK")
</pallas_src>

<mosaic_0001>
module attributes {stable_mosaic.version = 11 : i64} {
  func.func @geo_mlp_kernel(%arg0: i32, %arg1: i32, %arg2: memref<1x3x256xf32, #tpu.memory_space<vmem>>, %arg3: memref<1x32x1xf32, #tpu.memory_space<vmem>>, %arg4: memref<1x32x1xf32, #tpu.memory_space<vmem>>, %arg5: memref<32x3xf32, #tpu.memory_space<vmem>>, %arg6: memref<32x3xf32, #tpu.memory_space<vmem>>, %arg7: memref<7x32x32xf32, #tpu.memory_space<vmem>>, %arg8: memref<6x32x1xf32, #tpu.memory_space<vmem>>, %arg9: memref<1x32xf32, #tpu.memory_space<vmem>>, %arg10: memref<1x1xf32, #tpu.memory_space<vmem>>, %arg11: memref<1x1x256xf32, #tpu.memory_space<vmem>>) attributes {dimension_semantics = [#tpu.dimension_semantics<parallel>, #tpu.dimension_semantics<parallel>], iteration_bounds = array<i64: 2, 1>, scalar_prefetch = 0 : i64, scratch_operands = 0 : i64, tpu.core_type = #tpu.core_type<tc>, window_params = [{transform_indices = @transform_0, window_bounds = array<i64: 1, 3, 256>}, {transform_indices = @transform_1, window_bounds = array<i64: 1, 32, 1>}, {transform_indices = @transform_2, window_bounds = array<i64: 1, 32, 1>}, {pipeline_mode = #tpu.pipeline_mode<synchronous>, transform_indices = @transform_3, window_bounds = array<i64: 32, 3>}, {pipeline_mode = #tpu.pipeline_mode<synchronous>, transform_indices = @transform_4, window_bounds = array<i64: 32, 3>}, {pipeline_mode = #tpu.pipeline_mode<synchronous>, transform_indices = @transform_5, window_bounds = array<i64: 7, 32, 32>}, {pipeline_mode = #tpu.pipeline_mode<synchronous>, transform_indices = @transform_6, window_bounds = array<i64: 6, 32, 1>}, {pipeline_mode = #tpu.pipeline_mode<synchronous>, transform_indices = @transform_7, window_bounds = array<i64: 1, 32>}, {pipeline_mode = #tpu.pipeline_mode<synchronous>, transform_indices = @transform_8, window_bounds = array<i64: 1, 1>}, {transform_indices = @transform_9, window_bounds = array<i64: 1, 1, 256>}]} {
    %c0 = arith.constant 0 : index
    %c0_0 = arith.constant 0 : index
    %c0_1 = arith.constant 0 : index
    %0 = vector.load %arg2[%c0, %c0_0, %c0_1] : memref<1x3x256xf32, #tpu.memory_space<vmem>>, vector<1x3x256xf32>
    %1 = vector.shape_cast %0 : vector<1x3x256xf32> to vector<3x256xf32>
    %c0_2 = arith.constant 0 : index
    %c0_3 = arith.constant 0 : index
    %c0_4 = arith.constant 0 : index
    %2 = vector.load %arg3[%c0_2, %c0_3, %c0_4] : memref<1x32x1xf32, #tpu.memory_space<vmem>>, vector<1x32x1xf32>
    %3 = vector.shape_cast %2 : vector<1x32x1xf32> to vector<32x1xf32>
    %c0_5 = arith.constant 0 : index
    %c0_6 = arith.constant 0 : index
    %c0_7 = arith.constant 0 : index
    %4 = vector.load %arg4[%c0_5, %c0_6, %c0_7] : memref<1x32x1xf32, #tpu.memory_space<vmem>>, vector<1x32x1xf32>
    %5 = vector.shape_cast %4 : vector<1x32x1xf32> to vector<32x1xf32>
    %c0_8 = arith.constant 0 : index
    %c0_9 = arith.constant 0 : index
    %6 = vector.load %arg5[%c0_8, %c0_9] : memref<32x3xf32, #tpu.memory_space<vmem>>, vector<32x3xf32>
    %cst = arith.constant dense<0.000000e+00> : vector<32x256xf32>
    %7 = tpu.matmul %6, %1, %cst {dimension_numbers = #tpu.dot_dimension_numbers<[1], [0], [0], [1], [0, 0, 1, 1], [], []>} : vector<32x3xf32>, vector<3x256xf32>, vector<32x256xf32> -> vector<32x256xf32>
    %8 = vector.broadcast %3 : vector<32x1xf32> to vector<32x256xf32>
    %9 = arith.addf %7, %8 : vector<32x256xf32>
    %cst_10 = arith.constant 1.000000e+02 : f32
    %10 = vector.broadcast %cst_10 : f32 to vector<32x256xf32>
    %11 = arith.mulf %9, %10 : vector<32x256xf32>
    %cst_11 = arith.constant 2.000000e+01 : f32
    %12 = vector.broadcast %cst_11 : f32 to vector<32x256xf32>
    %13 = arith.minimumf %11, %12 : vector<32x256xf32>
    %cst_12 = arith.constant 2.000000e+01 : f32
    %14 = vector.broadcast %cst_12 : f32 to vector<32x256xf32>
    %15 = arith.cmpf ogt, %11, %14 : vector<32x256xf32>
    %16 = math.exp %13 : vector<32x256xf32>
    %17 = math.log1p %16 : vector<32x256xf32>
    %cst_13 = arith.constant 1.000000e+02 : f32
    %18 = vector.broadcast %cst_13 : f32 to vector<32x256xf32>
    %19 = arith.divf %17, %18 : vector<32x256xf32>
    %20 = arith.select %15, %9, %19 : vector<32x256xi1>, vector<32x256xf32>
    %c0_14 = arith.constant 0 : index
    %c0_15 = arith.constant 0 : index
    %c0_16 = arith.constant 0 : index
    %21 = vector.load %arg7[%c0_14, %c0_15, %c0_16] : memref<7x32x32xf32, #tpu.memory_space<vmem>>, vector<1x32x32xf32>
    %22 = vector.shape_cast %21 : vector<1x32x32xf32> to vector<32x32xf32>
    %cst_17 = arith.constant dense<0.000000e+00> : vector<32x256xf32>
    %23 = tpu.matmul %22, %20, %cst_17 {dimension_numbers = #tpu.dot_dimension_numbers<[1], [0], [0], [1], [0, 0, 1, 1], [], []>} : vector<32x32xf32>, vector<32x256xf32>, vector<32x256xf32> -> vector<32x256xf32>
    %c0_18 = arith.constant 0 : index
    %c0_19 = arith.constant 0 : index
    %c0_20 = arith.constant 0 : index
    %24 = vector.load %arg8[%c0_18, %c0_19, %c0_20] : memref<6x32x1xf32, #tpu.memory_space<vmem>>, vector<1x32x1xf32>
    %25 = vector.shape_cast %24 : vector<1x32x1xf32> to vector<32x1xf32>
    %26 = vector.broadcast %25 : vector<32x1xf32> to vector<32x256xf32>
    %27 = arith.addf %23, %26 : vector<32x256xf32>
    %cst_21 = arith.constant 1.000000e+02 : f32
    %28 = vector.broadcast %cst_21 : f32 to vector<32x256xf32>
    %29 = arith.mulf %27, %28 : vector<32x256xf32>
    %cst_22 = arith.constant 2.000000e+01 : f32
    %30 = vector.broadcast %cst_22 : f32 to vector<32x256xf32>
    %31 = arith.minimumf %29, %30 : vector<32x256xf32>
    %cst_23 = arith.constant 2.000000e+01 : f32
    %32 = vector.broadcast %cst_23 : f32 to vector<32x256xf32>
    %33 = arith.cmpf ogt, %29, %32 : vector<32x256xf32>
    %34 = math.exp %31 : vector<32x256xf32>
    %35 = math.log1p %34 : vector<32x256xf32>
    %cst_24 = arith.constant 1.000000e+02 : f32
    %36 = vector.broadcast %cst_24 : f32 to vector<32x256xf32>
    %37 = arith.divf %35, %36 : vector<32x256xf32>
    %38 = arith.select %33, %27, %37 : vector<32x256xi1>, vector<32x256xf32>
    %c1 = arith.constant 1 : index
    %c0_25 = arith.constant 0 : index
    %c0_26 = arith.constant 0 : index
    %39 = vector.load %arg7[%c1, %c0_25, %c0_26] : memref<7x32x32xf32, #tpu.memory_space<vmem>>, vector<1x32x32xf32>
    %40 = vector.shape_cast %39 : vector<1x32x32xf32> to vector<32x32xf32>
    %cst_27 = arith.constant dense<0.000000e+00> : vector<32x256xf32>
    %41 = tpu.matmul %40, %38, %cst_27 {dimension_numbers = #tpu.dot_dimension_numbers<[1], [0], [0], [1], [0, 0, 1, 1], [], []>} : vector<32x32xf32>, vector<32x256xf32>, vector<32x256xf32> -> vector<32x256xf32>
    %c1_28 = arith.constant 1 : index
    %c0_29 = arith.constant 0 : index
    %c0_30 = arith.constant 0 : index
    %42 = vector.load %arg8[%c1_28, %c0_29, %c0_30] : memref<6x32x1xf32, #tpu.memory_space<vmem>>, vector<1x32x1xf32>
    %43 = vector.shape_cast %42 : vector<1x32x1xf32> to vector<32x1xf32>
    %44 = vector.broadcast %43 : vector<32x1xf32> to vector<32x256xf32>
    %45 = arith.addf %41, %44 : vector<32x256xf32>
    %cst_31 = arith.constant 1.000000e+02 : f32
    %46 = vector.broadcast %cst_31 : f32 to vector<32x256xf32>
    %47 = arith.mulf %45, %46 : vector<32x256xf32>
    %cst_32 = arith.constant 2.000000e+01 : f32
    %48 = vector.broadcast %cst_32 : f32 to vector<32x256xf32>
    %49 = arith.minimumf %47, %48 : vector<32x256xf32>
    %cst_33 = arith.constant 2.000000e+01 : f32
    %50 = vector.broadcast %cst_33 : f32 to vector<32x256xf32>
    %51 = arith.cmpf ogt, %47, %50 : vector<32x256xf32>
    %52 = math.exp %49 : vector<32x256xf32>
    %53 = math.log1p %52 : vector<32x256xf32>
    %cst_34 = arith.constant 1.000000e+02 : f32
    %54 = vector.broadcast %cst_34 : f32 to vector<32x256xf32>
    %55 = arith.divf %53, %54 : vector<32x256xf32>
    %56 = arith.select %51, %45, %55 : vector<32x256xi1>, vector<32x256xf32>
    %c2 = arith.constant 2 : index
    %c0_35 = arith.constant 0 : index
    %c0_36 = arith.constant 0 : index
    %57 = vector.load %arg7[%c2, %c0_35, %c0_36] : memref<7x32x32xf32, #tpu.memory_space<vmem>>, vector<1x32x32xf32>
    %58 = vector.shape_cast %57 : vector<1x32x32xf32> to vector<32x32xf32>
    %cst_37 = arith.constant dense<0.000000e+00> : vector<32x256xf32>
    %59 = tpu.matmul %58, %56, %cst_37 {dimension_numbers = #tpu.dot_dimension_numbers<[1], [0], [0], [1], [0, 0, 1, 1], [], []>} : vector<32x32xf32>, vector<32x256xf32>, vector<32x256xf32> -> vector<32x256xf32>
    %c2_38 = arith.constant 2 : index
    %c0_39 = arith.constant 0 : index
    %c0_40 = arith.constant 0 : index
    %60 = vector.load %arg8[%c2_38, %c0_39, %c0_40] : memref<6x32x1xf32, #tpu.memory_space<vmem>>, vector<1x32x1xf32>
    %61 = vector.shape_cast %60 : vector<1x32x1xf32> to vector<32x1xf32>
    %62 = vector.broadcast %61 : vector<32x1xf32> to vector<32x256xf32>
    %63 = arith.addf %59, %62 : vector<32x256xf32>
    %cst_41 = arith.constant 1.000000e+02 : f32
    %64 = vector.broadcast %cst_41 : f32 to vector<32x256xf32>
    %65 = arith.mulf %63, %64 : vector<32x256xf32>
    %cst_42 = arith.constant 2.000000e+01 : f32
    %66 = vector.broadcast %cst_42 : f32 to vector<32x256xf32>
    %67 = arith.minimumf %65, %66 : vector<32x256xf32>
    %cst_43 = arith.constant 2.000000e+01 : f32
    %68 = vector.broadcast %cst_43 : f32 to vector<32x256xf32>
    %69 = arith.cmpf ogt, %65, %68 : vector<32x256xf32>
    %70 = math.exp %67 : vector<32x256xf32>
    %71 = math.log1p %70 : vector<32x256xf32>
    %cst_44 = arith.constant 1.000000e+02 : f32
    %72 = vector.broadcast %cst_44 : f32 to vector<32x256xf32>
    %73 = arith.divf %71, %72 : vector<32x256xf32>
    %74 = arith.select %69, %63, %73 : vector<32x256xi1>, vector<32x256xf32>
    %c3 = arith.constant 3 : index
    %c0_45 = arith.constant 0 : index
    %c0_46 = arith.constant 0 : index
    %75 = vector.load %arg7[%c3, %c0_45, %c0_46] : memref<7x32x32xf32, #tpu.memory_space<vmem>>, vector<1x32x32xf32>
    %76 = vector.shape_cast %75 : vector<1x32x32xf32> to vector<32x32xf32>
    %cst_47 = arith.constant dense<0.000000e+00> : vector<32x256xf32>
    %77 = tpu.matmul %76, %74, %cst_47 {dimension_numbers = #tpu.dot_dimension_numbers<[1], [0], [0], [1], [0, 0, 1, 1], [], []>} : vector<32x32xf32>, vector<32x256xf32>, vector<32x256xf32> -> vector<32x256xf32>
    %c0_48 = arith.constant 0 : index
    %c0_49 = arith.constant 0 : index
    %78 = vector.load %arg6[%c0_48, %c0_49] : memref<32x3xf32, #tpu.memory_space<vmem>>, vector<32x3xf32>
    %cst_50 = arith.constant dense<0.000000e+00> : vector<32x256xf32>
    %79 = tpu.matmul %78, %1, %cst_50 {dimension_numbers = #tpu.dot_dimension_numbers<[1], [0], [0], [1], [0, 0, 1, 1], [], []>} : vector<32x3xf32>, vector<3x256xf32>, vector<32x256xf32> -> vector<32x256xf32>
    %80 = arith.addf %77, %79 : vector<32x256xf32>
    %cst_51 = arith.constant 0.707106769 : f32
    %81 = vector.broadcast %cst_51 : f32 to vector<32x256xf32>
    %82 = arith.mulf %80, %81 : vector<32x256xf32>
    %83 = vector.broadcast %5 : vector<32x1xf32> to vector<32x256xf32>
    %84 = arith.addf %82, %83 : vector<32x256xf32>
    %cst_52 = arith.constant 1.000000e+02 : f32
    %85 = vector.broadcast %cst_52 : f32 to vector<32x256xf32>
    %86 = arith.mulf %84, %85 : vector<32x256xf32>
    %cst_53 = arith.constant 2.000000e+01 : f32
    %87 = vector.broadcast %cst_53 : f32 to vector<32x256xf32>
    %88 = arith.minimumf %86, %87 : vector<32x256xf32>
    %cst_54 = arith.constant 2.000000e+01 : f32
    %89 = vector.broadcast %cst_54 : f32 to vector<32x256xf32>
    %90 = arith.cmpf ogt, %86, %89 : vector<32x256xf32>
    %91 = math.exp %88 : vector<32x256xf32>
    %92 = math.log1p %91 : vector<32x256xf32>
    %cst_55 = arith.constant 1.000000e+02 : f32
    %93 = vector.broadcast %cst_55 : f32 to vector<32x256xf32>
    %94 = arith.divf %92, %93 : vector<32x256xf32>
    %95 = arith.select %90, %84, %94 : vector<32x256xi1>, vector<32x256xf32>
    %c4 = arith.constant 4 : index
    %c0_56 = arith.constant 0 : index
    %c0_57 = arith.constant 0 : index
    %96 = vector.load %arg7[%c4, %c0_56, %c0_57] : memref<7x32x32xf32, #tpu.memory_space<vmem>>, vector<1x32x32xf32>
    %97 = vector.shape_cast %96 : vector<1x32x32xf32> to vector<32x32xf32>
    %cst_58 = arith.constant dense<0.000000e+00> : vector<32x256xf32>
    %98 = tpu.matmul %97, %95, %cst_58 {dimension_numbers = #tpu.dot_dimension_numbers<[1], [0], [0], [1], [0, 0, 1, 1], [], []>} : vector<32x32xf32>, vector<32x256xf32>, vector<32x256xf32> -> vector<32x256xf32>
    %c3_59 = arith.constant 3 : index
    %c0_60 = arith.constant 0 : index
    %c0_61 = arith.constant 0 : index
    %99 = vector.load %arg8[%c3_59, %c0_60, %c0_61] : memref<6x32x1xf32, #tpu.memory_space<vmem>>, vector<1x32x1xf32>
    %100 = vector.shape_cast %99 : vector<1x32x1xf32> to vector<32x1xf32>
    %101 = vector.broadcast %100 : vector<32x1xf32> to vector<32x256xf32>
    %102 = arith.addf %98, %101 : vector<32x256xf32>
    %cst_62 = arith.constant 1.000000e+02 : f32
    %103 = vector.broadcast %cst_62 : f32 to vector<32x256xf32>
    %104 = arith.mulf %102, %103 : vector<32x256xf32>
    %cst_63 = arith.constant 2.000000e+01 : f32
    %105 = vector.broadcast %cst_63 : f32 to vector<32x256xf32>
    %106 = arith.minimumf %104, %105 : vector<32x256xf32>
    %cst_64 = arith.constant 2.000000e+01 : f32
    %107 = vector.broadcast %cst_64 : f32 to vector<32x256xf32>
    %108 = arith.cmpf ogt, %104, %107 : vector<32x256xf32>
    %109 = math.exp %106 : vector<32x256xf32>
    %110 = math.log1p %109 : vector<32x256xf32>
    %cst_65 = arith.constant 1.000000e+02 : f32
    %111 = vector.broadcast %cst_65 : f32 to vector<32x256xf32>
    %112 = arith.divf %110, %111 : vector<32x256xf32>
    %113 = arith.select %108, %102, %112 : vector<32x256xi1>, vector<32x256xf32>
    %c5 = arith.constant 5 : index
    %c0_66 = arith.constant 0 : index
    %c0_67 = arith.constant 0 : index
    %114 = vector.load %arg7[%c5, %c0_66, %c0_67] : memref<7x32x32xf32, #tpu.memory_space<vmem>>, vector<1x32x32xf32>
    %115 = vector.shape_cast %114 : vector<1x32x32xf32> to vector<32x32xf32>
    %cst_68 = arith.constant dense<0.000000e+00> : vector<32x256xf32>
    %116 = tpu.matmul %115, %113, %cst_68 {dimension_numbers = #tpu.dot_dimension_numbers<[1], [0], [0], [1], [0, 0, 1, 1], [], []>} : vector<32x32xf32>, vector<32x256xf32>, vector<32x256xf32> -> vector<32x256xf32>
    %c4_69 = arith.constant 4 : index
    %c0_70 = arith.constant 0 : index
    %c0_71 = arith.constant 0 : index
    %117 = vector.load %arg8[%c4_69, %c0_70, %c0_71] : memref<6x32x1xf32, #tpu.memory_space<vmem>>, vector<1x32x1xf32>
    %118 = vector.shape_cast %117 : vector<1x32x1xf32> to vector<32x1xf32>
    %119 = vector.broadcast %118 : vector<32x1xf32> to vector<32x256xf32>
    %120 = arith.addf %116, %119 : vector<32x256xf32>
    %cst_72 = arith.constant 1.000000e+02 : f32
    %121 = vector.broadcast %cst_72 : f32 to vector<32x256xf32>
    %122 = arith.mulf %120, %121 : vector<32x256xf32>
    %cst_73 = arith.constant 2.000000e+01 : f32
    %123 = vector.broadcast %cst_73 : f32 to vector<32x256xf32>
    %124 = arith.minimumf %122, %123 : vector<32x256xf32>
    %cst_74 = arith.constant 2.000000e+01 : f32
    %125 = vector.broadcast %cst_74 : f32 to vector<32x256xf32>
    %126 = arith.cmpf ogt, %122, %125 : vector<32x256xf32>
    %127 = math.exp %124 : vector<32x256xf32>
    %128 = math.log1p %127 : vector<32x256xf32>
    %cst_75 = arith.constant 1.000000e+02 : f32
    %129 = vector.broadcast %cst_75 : f32 to vector<32x256xf32>
    %130 = arith.divf %128, %129 : vector<32x256xf32>
    %131 = arith.select %126, %120, %130 : vector<32x256xi1>, vector<32x256xf32>
    %c6 = arith.constant 6 : index
    %c0_76 = arith.constant 0 : index
    %c0_77 = arith.constant 0 : index
    %132 = vector.load %arg7[%c6, %c0_76, %c0_77] : memref<7x32x32xf32, #tpu.memory_space<vmem>>, vector<1x32x32xf32>
    %133 = vector.shape_cast %132 : vector<1x32x32xf32> to vector<32x32xf32>
    %cst_78 = arith.constant dense<0.000000e+00> : vector<32x256xf32>
    %134 = tpu.matmul %133, %131, %cst_78 {dimension_numbers = #tpu.dot_dimension_numbers<[1], [0], [0], [1], [0, 0, 1, 1], [], []>} : vector<32x32xf32>, vector<32x256xf32>, vector<32x256xf32> -> vector<32x256xf32>
    %c5_79 = arith.constant 5 : index
    %c0_80 = arith.constant 0 : index
    %c0_81 = arith.constant 0 : index
    %135 = vector.load %arg8[%c5_79, %c0_80, %c0_81] : memref<6x32x1xf32, #tpu.memory_space<vmem>>, vector<1x32x1xf32>
    %136 = vector.shape_cast %135 : vector<1x32x1xf32> to vector<32x1xf32>
    %137 = vector.broadcast %136 : vector<32x1xf32> to vector<32x256xf32>
    %138 = arith.addf %134, %137 : vector<32x256xf32>
    %cst_82 = arith.constant 1.000000e+02 : f32
    %139 = vector.broadcast %cst_82 : f32 to vector<32x256xf32>
    %140 = arith.mulf %138, %139 : vector<32x256xf32>
    %cst_83 = arith.constant 2.000000e+01 : f32
    %141 = vector.broadcast %cst_83 : f32 to vector<32x256xf32>
    %142 = arith.minimumf %140, %141 : vector<32x256xf32>
    %cst_84 = arith.constant 2.000000e+01 : f32
    %143 = vector.broadcast %cst_84 : f32 to vector<32x256xf32>
    %144 = arith.cmpf ogt, %140, %143 : vector<32x256xf32>
    %145 = math.exp %142 : vector<32x256xf32>
    %146 = math.log1p %145 : vector<32x256xf32>
    %cst_85 = arith.constant 1.000000e+02 : f32
    %147 = vector.broadcast %cst_85 : f32 to vector<32x256xf32>
    %148 = arith.divf %146, %147 : vector<32x256xf32>
    %149 = arith.select %144, %138, %148 : vector<32x256xi1>, vector<32x256xf32>
    %c0_86 = arith.constant 0 : index
    %c0_87 = arith.constant 0 : index
    %150 = vector.load %arg9[%c0_86, %c0_87] : memref<1x32xf32, #tpu.memory_space<vmem>>, vector<1x32xf32>
    %cst_88 = arith.constant dense<0.000000e+00> : vector<1x256xf32>
    %151 = tpu.matmul %150, %149, %cst_88 {dimension_numbers = #tpu.dot_dimension_numbers<[1], [0], [0], [1], [0, 0, 1, 1], [], []>} : vector<1x32xf32>, vector<32x256xf32>, vector<1x256xf32> -> vector<1x256xf32>
    %c0_89 = arith.constant 0 : index
    %c0_90 = arith.constant 0 : index
    %152 = vector.load %arg10[%c0_89, %c0_90] : memref<1x1xf32, #tpu.memory_space<vmem>>, vector<1x1xf32>
    %153 = vector.broadcast %152 : vector<1x1xf32> to vector<1x256xf32>
    %154 = arith.addf %151, %153 : vector<1x256xf32>
    %c0_91 = arith.constant 0 : index
    %c0_92 = arith.constant 0 : index
    %c0_93 = arith.constant 0 : index
    %155 = vector.load %arg11[%c0_91, %c0_92, %c0_93] : memref<1x1x256xf32, #tpu.memory_space<vmem>>, vector<1x1x256xf32>
    %156 = vector.shape_cast %155 : vector<1x1x256xf32> to vector<1x256xf32>
    %157 = vector.shape_cast %154 : vector<1x256xf32> to vector<1x1x256xf32>
    tpu.vector_store %arg11[%c0_91, %c0_92, %c0_93], %157 {strides = array<i32>} : memref<1x1x256xf32, #tpu.memory_space<vmem>>, vector<1x1x256xf32>,
    return
  }
  func.func @transform_0(%arg0: i32, %arg1: i32) -> (i32, i32, i32) {
    %c0_i32 = arith.constant 0 : i32
    %c0_i32_0 = arith.constant 0 : i32
    return %arg0, %c0_i32, %arg1 : i32, i32, i32
  }
  func.func @transform_1(%arg0: i32, %arg1: i32) -> (i32, i32, i32) {
    %c0_i32 = arith.constant 0 : i32
    %c0_i32_0 = arith.constant 0 : i32
    %c0_i32_1 = arith.constant 0 : i32
    return %arg0, %c0_i32, %c0_i32_0 : i32, i32, i32
  }
  func.func @transform_2(%arg0: i32, %arg1: i32) -> (i32, i32, i32) {
    %c0_i32 = arith.constant 0 : i32
    %c0_i32_0 = arith.constant 0 : i32
    %c0_i32_1 = arith.constant 0 : i32
    return %arg0, %c0_i32, %c0_i32_0 : i32, i32, i32
  }
  func.func @transform_3(%arg0: i32, %arg1: i32) -> (i32, i32) {
    %c0_i32 = arith.constant 0 : i32
    %c0_i32_0 = arith.constant 0 : i32
    %c0_i32_1 = arith.constant 0 : i32
    return %c0_i32, %c0_i32_0 : i32, i32
  }
  func.func @transform_4(%arg0: i32, %arg1: i32) -> (i32, i32) {
    %c0_i32 = arith.constant 0 : i32
    %c0_i32_0 = arith.constant 0 : i32
    %c0_i32_1 = arith.constant 0 : i32
    return %c0_i32, %c0_i32_0 : i32, i32
  }
  func.func @transform_5(%arg0: i32, %arg1: i32) -> (i32, i32, i32) {
    %c0_i32 = arith.constant 0 : i32
    %c0_i32_0 = arith.constant 0 : i32
    %c0_i32_1 = arith.constant 0 : i32
    %c0_i32_2 = arith.constant 0 : i32
    return %c0_i32, %c0_i32_0, %c0_i32_1 : i32, i32, i32
  }
  func.func @transform_6(%arg0: i32, %arg1: i32) -> (i32, i32, i32) {
    %c0_i32 = arith.constant 0 : i32
    %c0_i32_0 = arith.constant 0 : i32
    %c0_i32_1 = arith.constant 0 : i32
    %c0_i32_2 = arith.constant 0 : i32
    return %c0_i32, %c0_i32_0, %c0_i32_1 : i32, i32, i32
  }
  func.func @transform_7(%arg0: i32, %arg1: i32) -> (i32, i32) {
    %c0_i32 = arith.constant 0 : i32
    %c0_i32_0 = arith.constant 0 : i32
    %c0_i32_1 = arith.constant 0 : i32
    return %c0_i32, %c0_i32_0 : i32, i32
  }
  func.func @transform_8(%arg0: i32, %arg1: i32) -> (i32, i32) {
    %c0_i32 = arith.constant 0 : i32
    %c0_i32_0 = arith.constant 0 : i32
    %c0_i32_1 = arith.constant 0 : i32
    return %c0_i32, %c0_i32_0 : i32, i32
  }
  func.func @transform_9(%arg0: i32, %arg1: i32) -> (i32, i32, i32) {
    %c0_i32 = arith.constant 0 : i32
    %c0_i32_0 = arith.constant 0 : i32
    return %arg0, %c0_i32, %arg1 : i32, i32, i32
  }
}

</mosaic_0001>

<bundles_post_ra>
// kernel: tpu_custom_call.1
= control target key start
LH: loop header
LB: loop body
LE: loop exit
PB: predicated region body
PF: predicated region fallthrough
CT: control target
= control target key end

     0   :  { %s4597_s0 = inlined_call_operand.vmem [shape: f32[2,3,256], index: 0, kind: input, shape index: {}]   ;;  %s4598_s1 = inlined_call_operand.vmem [shape: f32[2,32,1], index: 1, kind: input, shape index: {}]   ;;  %s4599_s2 = inlined_call_operand.vmem [shape: f32[2,32,1], index: 2, kind: input, shape index: {}]   ;;  %s4600_s3 = inlined_call_operand.vmem [shape: f32[32,3], index: 3, kind: input, shape index: {}]   ;;  %s4601_s4 = inlined_call_operand.vmem [shape: f32[32,3], index: 4, kind: input, shape index: {}]   ;;  %s4602_s5 = inlined_call_operand.vmem [shape: f32[7,32,32], index: 5, kind: input, shape index: {}]   ;;  %s4603_s6 = inlined_call_operand.vmem [shape: f32[6,32,1], index: 6, kind: input, shape index: {}]   ;;  %s4604_s7 = inlined_call_operand.vmem [shape: f32[1,32], index: 7, kind: input, shape index: {}]   ;;  %s4605_s8 = inlined_call_operand.<no memory space> [shape: f32[1,1], index: 8, kind: input, shape index: {}]   ;;  %s4606_s9 = inlined_call_operand.hbm [shape: f32[2,1,256], index: 9, kind: output, shape index: {}]  }
   0x1   :  { %v14_v0 = vstv %s4605_s8 }
   0x2   :  { %15 = vst [vmem:[#allocation2] sm:$0x1] %v14_v0 }
   0x3   :  { %16 = vsyncpa [#allocation4], 0 }
   0x4   :  { %18 = vsyncpa [#allocation4 + $0x1], 0  ;;  %s3114_s11 = smov 0   ;;  %s3116_s12 = smov 0  }
   0x5   :  { %s3118_s13 = smov 0   ;;  %s3120_s14 = smov 0  }
   0x6   :  { %s3122_s15 = smov 0   ;;  %s3124_s16 = smov 0  }
   0x7 LB: > { %s2518_s8 = sadd.s32 4294967295, %s3057_s16   ;;  %s2519_s17 = sadd.s32 4294967294, %s3057_s16   ;;  %s3057_s16 = sphi %s3124_s16, %s24_s16   ;;  %s3053_s15 = sphi %s3122_s15, %s4691_s15   ;;  %s3049_s14 = sphi %s3120_s14, %s4690_s14   ;;  %s3045_s13 = sphi %s3118_s13, %s4689_s13   ;;  %s3041_s12 = sphi %s3116_s12, %s4688_s12   ;;  %s3037_s11 = sphi %s3114_s11, %s4687_s11  }
   0x8   : > { %s36_s18 = sadd.s32 1, %s3053_s15  ;;  %s251_s19 = sadd.s32 1, %s3045_s13 }
   0x9   : > { %p38_p0 = scmp.ge.s32.totalorder %s36_s18, 2  ;;  %p261_p1 = scmp.ne.s32.totalorder %s3045_s13, %s3041_s12 }
   0xa   : > { %p262_p2 = scmp.eq.s32.totalorder %s2518_s8, 1  ;;  %p267_p3 = scmp.ne.s32.totalorder %s3041_s12, %s3037_s11 }
   0xb   : > { %s4693_s18 = smov (%p38_p0, %s36_s18), 0  ;;  %p268_p5 = scmp.eq.s32.totalorder %s2519_s17, 1 }
   0xc   : > { %p3154_p4 = por %p262_p2, %p261_p1  ;;  %s246_s21 = ssub.s32 %s3053_s15, %s4693_s18 }
   0xd   : > { %p2522_p6 = scmp.ge.s32.totalorder %s3057_s16, 1  ;;  %p249_p7 = scmp.eq.s32.totalorder %s246_s21, 0 }
   0xe   : > { %p3161_p8 = por %p268_p5, %p267_p3  ;;  %p333_p9 = scmp.lt.s32.totalorder %s3057_s16, 3 }
   0xf   : > { %s3167_s23 = scalar_select %p249_p7, %s3045_s13, %s251_s19  }
  0x10   : > { %p334_p10 = pnand %p2522_p6, %p333_p9 }
  0x11   : > { %p384_p11 = scmp.lt.s32.totalorder (!%p334_p10), %s3049_s14, 1  ;;  %s380_s10 = sand.u32 (!%p334_p10), 1, %s3041_s12  }
  0x12   : > { %337 = sbr.rel (%p334_p10) target bundleno = 1694 (0x69e), region = 56  ;;  %s2653_s17 = sshll.u32 (!%p334_p10), %s3049_s14, 1 }
  0x13   : > { %s2414_s27 = scalar_lea.hbm (!%p334_p10), %s4606_s9, %s2653_s17  ;;  %s2999_s17 = scalar_lea.hbm (!%p334_p10), %s4606_s9, 4 }
  0x17   : > { %v3059_v1 = vmov 0   ;;  %s3171_s24 = scalar_select %p384_p11, %s3049_s14, 1  ;;  %vm454_vm0 = vcmask 1042432   ;;  %v413_v9 = vld [vmem:[%s4600_s3] sm:$0xff]  ;;  %vm441_vm1 = vcmask 23552   ;;  %v416_v10 = vld [vmem:[%s4600_s3 + $0x18] sm:$0xff] }
  0x18   : > { %2719 = vset.pattern.permute.xlu1 %v3059_v1  ;;  %2718 = vset.pattern.permute.xlu0 %v3059_v1  ;;  %v657_v11 = vld [vmem:[%s4603_s6 + $0x8] sm:$0xff]  ;;  %v656_v12 = vld [vmem:[%s4603_s6] sm:$0xff]  ;;  %v2554_v14 = vld [vmem:[%s4603_s6 + $0x30] sm:$0xff]  ;;  %v3060_v40 = vmov 100.0   ;;  %s2402_s14 = scalar_lea.sflag [#allocation4], %s380_s10 }
  0x19   : > { %2720 = vset.pattern.permute.xlu2 %v3059_v1  ;;  %s2657_s25 = sshll.u32 %s3171_s24, 5  ;;  %s2656_s26 = sshll.u32 %s3171_s24, 3  ;;  %v414_v13 = vld [vmem:[%s4600_s3 + $0x8] sm:$0xff]  ;;  %v415_v16 = vld [vmem:[%s4600_s3 + $0x10] sm:$0xff]  ;;  %v2571_v17 = vld [vmem:[%s4603_s6 + $0x58] sm:$0xff]  ;;  %2721 = vrcp.f32 %v3060_v40 }
  0x1a   : > { %s397_s29 = scalar_lea.vmem %s4598_s1, %s2657_s25  ;;  %s391_s8 = scalar_lea.vmem %s4597_s0, %s2656_s26  ;;  %v2553_v15 = vld [vmem:[%s4603_s6 + $0x28] sm:$0xff]  ;;  %v2570_v18 = vld [vmem:[%s4603_s6 + $0x50] sm:$0xff]  ;;  %v2568_v19 = vld [vmem:[%s4603_s6 + $0x40] sm:$0xff] }
  0x1b   : > { %v408_v2 = vld [vmem:[%s397_s29 + $0x18] sm:$0xff]  ;;  %v404_v3 = vld [vmem:[%s391_s8] sm:$0x77]  ;;  %v406_v4 = vld [vmem:[%s397_s29 + $0x8] sm:$0xff]  ;;  %s3230_s21 = scalar_lea.vmem %s4599_s2, %s2657_s25  ;;  %s2523_s8 = sshll.u32 %s380_s10, 1 }
  0x1c   : > { %434 = vperm.xlu0 %2718, %v408_v2   ;;  %438 = vst [vmem:[#allocation1] ss:$2 sm:$0xff] %v404_v3  ;;  %424 = vperm.xlu1 %2719, %v406_v4   ;;  %v407_v5 = vld [vmem:[%s397_s29 + $0x10] sm:$0xff]  ;;  %v405_v6 = vld [vmem:[%s397_s29] sm:$0xff]  ;;  %v412_v20 = vld [vmem:[%s3230_s21 + $0x18] sm:$0xff]  ;;  %s382_s24 = scalar_lea.vmem [#allocation3], %s2523_s8 }
  0x1d   : > { %v410_v21 = vld [vmem:[%s3230_s21 + $0x8] sm:$0xff]  ;;  %v409_v22 = vld [vmem:[%s3230_s21] sm:$0xff]  ;;  %v2608_v23 = vld [vmem:[%s4603_s6 + $0x70] sm:$0xff]  ;;  %s2416_s28 = sshll.u32 %s382_s24, 4  ;;  %s2418_s25 = sshll.u32 %s2414_s27, 4  ;;  %s2417_s28 = int_to_ptr.vmem [resolvable:$true] %s2416_s28  ;;  %s2419_s25 = int_to_ptr.hbm [resolvable:$true] %s2418_s25 }
  0x1e   : > { %v2607_v24 = vld [vmem:[%s4603_s6 + $0x68] sm:$0xff]  ;;  %v2625_v25 = vld [vmem:[%s4603_s6 + $0x98] sm:$0xff]  ;;  %v2624_v26 = vld [vmem:[%s4603_s6 + $0x90] sm:$0xff]  ;;  %s2993_s29 = sshra.s32 %s2419_s25, 4  ;;  %s2994_s29 = int_to_ptr.hbm [resolvable:$true] %s2993_s29 }
  0x1f   : > { %v2622_v27 = vld [vmem:[%s4603_s6 + $0x80] sm:$0xff]  ;;  %v2641_v28 = vld [vmem:[%s4603_s6 + $0xb8] sm:$0xff]  ;;  %v2639_v29 = vld [vmem:[%s4603_s6 + $0xa8] sm:$0xff]  ;;  %v3289_v54 = vpop.eup %2721  ;;  %p3000_p1 = scmp.lt.s32.totalorder %s2994_s29, %s4606_s9 }
  0x20   : > { %v2638_v30 = vld [vmem:[%s4603_s6 + $0xa0] sm:$0xff]  ;;  %v659_v32 = vld [vmem:[%s4603_s6 + $0x18] sm:$0xff]  ;;  %v658_v50 = vld [vmem:[%s4603_s6 + $0x10] sm:$0xff]  ;;  %v630_v0 = vmul.f32 100.0, %v3289_v54  ;;  %vm634_vm2 = vweird.f32 %v3289_v54 }
  0x21   : > { %677 = vperm.xlu2 %2720, %v659_v32  }
  0x23   : > { %v439_v7 = vld.sshfl [vmem:[#allocation1] sm:$0xff pattern:$0x75316420]  ;;  %v440_v8 = vld.sshfl [vmem:[#allocation1 + $0x8] sm:$0xff pattern:$0x75316420] }
  0x24   : > { %429 = vperm.xlu0 %2718, %v407_v5   ;;  %419 = vperm.xlu1 %2719, %v405_v6   ;;  %1344 = vst [vmem:[#allocation1] ss:$2 sm:$0xff] %v404_v3  ;;  %v2555_v3 = vld [vmem:[%s4603_s6 + $0x38] sm:$0xff] }
  0x25   : > { %2530 = vmatpush.msk.msra.mxu0 %vm454_vm0, %v439_v7  ;;  %2659 = vmatpush.msk.msra.mxu2 %vm454_vm0, %v439_v7 }
  0x26   : > { %2535 = vmatpush.msk.msra.mxu1 %vm454_vm0, %v440_v8  ;;  %2660 = vmatpush.msk.msra.mxu3 %vm454_vm0, %v440_v8 }
  0x27   : > { %2531 = vmatmul.msk.f32.vlgmr.msra.gmra.mxu0 %vm441_vm1, %v413_v9  ;;  %2534 = vmatmul.msk.f32.vlgmr.msra.gmra.mxu2 %vm441_vm1, %v416_v10 }
  0x28   : > { %2536 = vmatmul.msk.f32.vlgmr.msra.gmra.mxu1 %vm441_vm1, %v413_v9  ;;  %2539 = vmatmul.msk.f32.vlgmr.msra.gmra.mxu3 %vm441_vm1, %v416_v10 }
  0x29   : > { %672 = vperm.xlu2 %2720, %v658_v50  }
  0x2c   : > { %667 = vperm.xlu0 %2718, %v657_v11   ;;  %662 = vperm.xlu1 %2719, %v656_v12   ;;  %v631_v11 = vsub.f32 1.0, %v630_v0 }
  0x2f   : > { %2532 = vmatmul.msk.f32.gmra.mxu0 %vm441_vm1, %v414_v13 }
  0x30   : > { %2537 = vmatmul.msk.f32.gmra.mxu1 %vm441_vm1, %v414_v13 }
  0x31   : > { %906 = vperm.xlu2 %2720, %v2555_v3  }
  0x34   : > { %901 = vperm.xlu0 %2718, %v2554_v14   ;;  %896 = vperm.xlu1 %2719, %v2553_v15  }
  0x37   : > { %2533 = vmatmul.msk.f32.gmra.mxu0 %vm441_vm1, %v415_v16 }
  0x38   : > { %2538 = vmatmul.msk.f32.gmra.mxu1 %vm441_vm1, %v415_v16 }
  0x3c   : > { %1134 = vperm.xlu0 %2718, %v2571_v17   ;;  %1129 = vperm.xlu1 %2719, %v2570_v18  }
  0x44   : > { %1119 = vperm.xlu0 %2718, %v2568_v19   ;;  %1516 = vperm.xlu1 %2719, %v412_v20   ;;  %v632_v19 = vmul.f32 %v3289_v54, %v631_v11 }
  0x4c   : > { %1506 = vperm.xlu0 %2718, %v410_v21   ;;  %1501 = vperm.xlu1 %2719, %v409_v22  }
  0x54   : > { %1677 = vperm.xlu0 %2718, %v2608_v23   ;;  %1672 = vperm.xlu1 %2719, %v2607_v24   ;;  %v2552_v23 = vld [vmem:[%s4603_s6 + $0x20] sm:$0xff] }
  0x55   : > { %891 = vperm.xlu2 %2720, %v2552_v23  }
  0x5c   : > { %1910 = vperm.xlu0 %2718, %v2625_v25   ;;  %1905 = vperm.xlu1 %2719, %v2624_v26  }
  0x64   : > { %1895 = vperm.xlu0 %2718, %v2622_v27   ;;  %2138 = vperm.xlu1 %2719, %v2641_v28  }
  0x6c   : > { %2128 = vperm.xlu0 %2718, %v2639_v29   ;;  %2123 = vperm.xlu1 %2719, %v2638_v30   ;;  %v633_v30 = vadd.f32 %v3289_v54, %v632_v19 }
  0x8e   : > { %v425_v31 = vpop.permute.xlu1 %424  ;;  %v435_v42 = vpop.permute.xlu0 %434 }
  0x96   : > { %v420_v33 = vpop.permute.xlu1 %419  ;;  %v430_v6 = vpop.permute.xlu0 %429 }
  0xa4   : > { %v476_v34 = vpop.f32.mrf.mxu0 }
  0xa5   : > { %v3265_v35 = vadd.f32 %v476_v34, %v420_v33  ;;  %v505_v36 = vpop.f32.mrf.mxu1 }
  0xa6   : > { %v3267_v37 = vadd.f32 %v505_v36, %v420_v33 }
  0xa7   : > { %v3270_v38 = vmul.f32 100.0, %v3265_v35 }
  0xa8   : > { %v3273_v39 = vmul.f32 100.0, %v3267_v37 }
  0xa9   : > { %v525_v41 = vmin.f32 %v3270_v38, 20.0 }
  0xaa   : > { %v526_v43 = vmin.f32 %v3273_v39, 20.0  ;;  %v485_v44 = vpop.f32.mrf.mxu2 }
  0xab   : > { %v541_v45 = vmul.f32 1.442695, %v525_v41  ;;  %v3277_v46 = vadd.f32 %v485_v44, %v435_v42  ;;  %v514_v47 = vpop.f32.mrf.mxu3 }
  0xac   : > { %v3279_v48 = vadd.f32 %v514_v47, %v435_v42  ;;  %v479_v49 = vpop.f32.mrf.mxu0  ;;  %v543_v55 = vmul.f32 1.442695, %v526_v43  ;;  %v3343_v43 = vsel %vm634_vm2, %v3289_v54, %v633_v30 }
  0xad   : > { %v3285_v51 = vmul.f32 100.0, %v3277_v46  ;;  %v3287_v52 = vadd.f32 %v479_v49, %v425_v31  ;;  %v508_v53 = vpop.f32.mrf.mxu1  ;;  %2723 = vpow2.f32 %v541_v45 }
  0xae   : > { %v3292_v56 = vmul.f32 100.0, %v3279_v48  ;;  %v3294_v57 = vadd.f32 %v508_v53, %v425_v31  ;;  %2725 = vpow2.f32 %v543_v55  ;;  %v2569_v53 = vld [vmem:[%s4603_s6 + $0x48] sm:$0xff] }
  0xaf   : > { %v531_v58 = vmin.f32 %v3285_v51, 20.0  ;;  %v3298_v59 = vmul.f32 100.0, %v3287_v52  ;;  %vm539_vm3 = vcmp.gt.f32.partialorder %v3285_v51, 20.0  ;;  %1124 = vperm.xlu2 %2720, %v2569_v53  }
  0xb0   : > { %v532_v60 = vmin.f32 %v3292_v56, 20.0  ;;  %v3302_v61 = vmul.f32 100.0, %v3294_v57  ;;  %vm540_vm4 = vcmp.gt.f32.partialorder %v3292_v56, 20.0 }
  0xb1   : > { %v553_v62 = vmul.f32 1.442695, %v531_v58  ;;  %v527_v63 = vmin.f32 %v3298_v59, 20.0  ;;  %vm535_vm15 = vcmp.gt.f32.partialorder %v3298_v59, 20.0 }
  0xb2   : > { %v555_v1 = vmul.f32 1.442695, %v532_v60  ;;  %v528_v2 = vmin.f32 %v3302_v61, 20.0  ;;  %vm536_vm2 = vcmp.gt.f32.partialorder %v3302_v61, 20.0  ;;  %v655_v61 = vld [vmem:[%s4602_s5 + $0x18] sm:$0xff] }
  0xb3   : > { %2727 = vpow2.f32 %v553_v62  ;;  %v545_v4 = vmul.f32 1.442695, %v527_v63  ;;  %v3310_v5 = vpop.eup %2723 }
  0xb4   : > { %2729 = vpow2.f32 %v555_v1  ;;  %v547_v7 = vmul.f32 1.442695, %v528_v2  ;;  %v482_v8 = vpop.f32.mrf.mxu0  ;;  %v557_v14 = vadd.f32 1.0, %v3310_v5  ;;  %v3320_v15 = vpop.eup %2725  ;;  %v560_v33 = vmul.f32 -0.5, %v3310_v5 }
  0xb5   : > { %2731 = vpow2.f32 %v545_v4  ;;  %v3312_v9 = vadd.f32 %v482_v8, %v430_v6  ;;  %v511_v10 = vpop.f32.mrf.mxu1  ;;  %v566_v34 = vadd.f32 1.0, %v3320_v15  ;;  %v563_v49 = vand.u32 2147483647, %v3310_v5 }
  0xb6   : > { %2733 = vpow2.f32 %v547_v7  ;;  %v3314_v12 = vadd.f32 %v511_v10, %v430_v6  ;;  %v561_v47 = vadd.f32 1.0, %v560_v33  ;;  %v569_v50 = vmul.f32 -0.5, %v3320_v15 }
  0xb7   : > { %v3317_v13 = vmul.f32 100.0, %v3312_v9  ;;  %2735 = vlog2.f32 %v557_v14  ;;  %v572_v2 = vand.u32 2147483647, %v3320_v15  ;;  %vm3355_vm6 = vcmp.lt.f32.partialorder %v563_v49, 0.0004427343 }
  0xb8   : > { %v3323_v16 = vmul.f32 100.0, %v3314_v12 }
  0xb9   : > { %v2728_v17 = vpop.eup %2727  ;;  %v529_v18 = vmin.f32 %v3317_v13, 20.0  ;;  %vm573_vm12 = vcmp.lt.f32.partialorder %v572_v2, 0.0004427343  ;;  %vm537_vm13 = vcmp.gt.f32.partialorder %v3317_v13, 20.0  ;;  %v2609_v2 = vld [vmem:[%s4603_s6 + $0x78] sm:$0xff] }
  0xba   : > { %v2730_v20 = vpop.eup %2729  ;;  %v530_v21 = vmin.f32 %v3323_v16, 20.0  ;;  %v611_v22 = vadd.f32 1.0, %v2728_v17  ;;  %v614_v26 = vmul.f32 -0.5, %v2728_v17  ;;  %v617_v41 = vand.u32 2147483647, %v2728_v17 }
  0xbb   : > { %v3331_v24 = vpop.eup %2731  ;;  %v549_v25 = vmul.f32 1.442695, %v529_v18  ;;  %v620_v27 = vadd.f32 1.0, %v2730_v20  ;;  %v623_v31 = vmul.f32 -0.5, %v2730_v20  ;;  %v626_v54 = vand.u32 2147483647, %v2730_v20 }
  0xbc   : > { %v3333_v28 = vpop.eup %2733  ;;  %v551_v29 = vmul.f32 1.442695, %v530_v21  ;;  %2737 = vlog2.f32 %v611_v22  ;;  %v575_v32 = vadd.f32 1.0, %v3331_v24  ;;  %v615_v36 = vadd.f32 1.0, %v614_v26 }
  0xbd   : > { %2739 = vpow2.f32 %v549_v25  ;;  %v584_v40 = vadd.f32 1.0, %v3333_v28  ;;  %v2736_v42 = vpop.eup %2735  ;;  %v624_v44 = vadd.f32 1.0, %v623_v31  ;;  %v578_v62 = vmul.f32 -0.5, %v3331_v24 }
  0xbe   : > { %2741 = vpow2.f32 %v551_v29  ;;  %v616_v60 = vmul.f32 %v2728_v17, %v615_v36  ;;  %vm618_vm5 = vcmp.lt.f32.partialorder %v617_v41, 0.0004427343  ;;  %v587_v1 = vmul.f32 -0.5, %v3333_v28  ;;  %v411_v41 = vld [vmem:[%s3230_s21 + $0x10] sm:$0xff]  ;;  %s2995_s21 = scalar_lea.hbm %s2994_s29, 2 }
  0xbf   : > { %2743 = vlog2.f32 %v620_v27  ;;  %v625_v6 = vmul.f32 %v2730_v20, %v624_v44  ;;  %vm627_vm7 = vcmp.lt.f32.partialorder %v626_v54, 0.0004427343  ;;  %v579_v21 = vadd.f32 1.0, %v578_v62  ;;  %1511 = vperm.xlu2 %2720, %v411_v41   ;;  %p2996_p12 = scmp.ne.s32.totalorder %s2994_s29, %s2995_s21  ;;  %p3001_p2 = scmp.lt.s32.totalorder %s2999_s17, %s2995_s21 }
  0xc0   : > { %2745 = vlog2.f32 %v575_v32  ;;  %v581_v20 = vand.u32 2147483647, %v3331_v24  ;;  %v588_v26 = vadd.f32 1.0, %v587_v1  ;;  %v590_v27 = vand.u32 2147483647, %v3333_v28 }
  0xc1   : > { %2747 = vlog2.f32 %v584_v40  ;;  %v570_v32 = vadd.f32 1.0, %v569_v50  ;;  %v562_v40 = vmul.f32 %v3310_v5, %v561_v47  ;;  %v580_v44 = vmul.f32 %v3331_v24, %v579_v21  ;;  %p2997_p13 = pnand %p2996_p12, %p3154_p4  ;;  %p3002_p3 = por %p3001_p2, %p3000_p1 }
  0xc2   : > { %v2738_v45 = vpop.eup %2737  ;;  %2749 = vlog2.f32 %v566_v34  ;;  %vm3371_vm8 = vcmp.lt.f32.partialorder %v581_v20, 0.0004427343  ;;  %v589_v50 = vmul.f32 %v3333_v28, %v588_v26  ;;  %vm3376_vm9 = vcmp.lt.f32.partialorder %v590_v27, 0.0004427343 }
  0xc3   : > { %v2740_v55 = vpop.eup %2739  ;;  %v613_v58 = vmul.f32 0.6931472, %v2738_v45  ;;  %v559_v45 = vmul.f32 0.6931472, %v2736_v42  ;;  %v571_v42 = vmul.f32 %v3320_v15, %v570_v32  ;;  %vm538_vm14 = vcmp.gt.f32.partialorder %v3323_v16, 20.0  ;;  %v652_v16 = vld [vmem:[%s4602_s5] sm:$0xff]  ;;  %p2998_p0 = pneg %p2997_p13 }
  0xc4   : > { %v2742_v63 = vpop.eup %2741  ;;  %v593_v0 = vadd.f32 1.0, %v2740_v55  ;;  %v596_v7 = vmul.f32 -0.5, %v2740_v55  ;;  %v599_v33 = vand.u32 2147483647, %v2740_v55 }
  0xc5   : > { %v2744_v3 = vpop.eup %2743  ;;  %v619_v4 = vsel %vm618_vm5, %v616_v60, %v613_v58  ;;  %v602_v8 = vadd.f32 1.0, %v2742_v63  ;;  %v605_v17 = vmul.f32 -0.5, %v2742_v63  ;;  %v608_v51 = vand.u32 2147483647, %v2742_v63  ;;  %p3003_p5 = pnand %p3002_p3, %p2998_p0 }
  0xc6   : > { %v2746_v10 = vpop.eup %2745  ;;  %v642_v11 = vmul.f32 %v3343_v43, %v619_v4  ;;  %v622_v14 = vmul.f32 0.6931472, %v2744_v3  ;;  %2751 = vlog2.f32 %v593_v0  ;;  %v597_v30 = vadd.f32 1.0, %v596_v7 }
  0xc7   : > { %v2748_v19 = vpop.eup %2747  ;;  %2753 = vlog2.f32 %v602_v8  ;;  %v577_v31 = vmul.f32 0.6931472, %v2746_v10  ;;  %v606_v34 = vadd.f32 1.0, %v605_v17  ;;  %vm600_vm10 = vcmp.lt.f32.partialorder %v599_v33, 0.0004427343  ;;  %1682 = vperm.xlu2 %2720, %v2609_v2   ;;  %v663_v17 = vpop.permute.xlu1 %662 }
  0xc8   : > { %v2750_v22 = vpop.eup %2749  ;;  %v650_v23 = vsel %vm539_vm3, %v3277_v46, %v642_v11  ;;  %v628_v25 = vsel %vm627_vm7, %v625_v6, %v622_v14  ;;  %v586_v36 = vmul.f32 0.6931472, %v2748_v19  ;;  %vm609_vm11 = vcmp.lt.f32.partialorder %v608_v51, 0.0004427343  ;;  %v678_v19 = vpop.permute.xlu2 %677 }
  0xc9   : > { %705 = vmatpush.msrb.mxu2 %v650_v23  ;;  %v643_v29 = vmul.f32 %v3343_v43, %v628_v25  ;;  %v568_v5 = vmul.f32 0.6931472, %v2750_v22  ;;  %v583_v24 = vsel %vm3371_vm8, %v580_v44, %v577_v31  ;;  %v607_v54 = vmul.f32 %v2742_v63, %v606_v34  ;;  %v668_v22 = vpop.permute.xlu0 %667 }
  0xca   : > { %v592_v28 = vsel %vm3376_vm9, %v589_v50, %v586_v36  ;;  %v565_v0 = vsel %vm3355_vm6, %v562_v40, %v559_v45  ;;  %v638_v3 = vmul.f32 %v3343_v43, %v583_v24  ;;  %vm533_vm3 = vcmp.gt.f32.partialorder %v3270_v38, 20.0  ;;  %v2606_v38 = vld [vmem:[%s4603_s6 + $0x60] sm:$0xff] }
  0xcb   : > { %v651_v46 = vsel %vm540_vm4, %v3279_v48, %v643_v29  ;;  %v598_v48 = vmul.f32 %v2740_v55, %v597_v30  ;;  %v574_v4 = vsel %vm573_vm12, %v571_v42, %v568_v5  ;;  %v639_v63 = vmul.f32 %v3343_v43, %v592_v28 }
  0xcc   : > { %v2752_v49 = vpop.eup %2751  ;;  %734 = vmatpush.msrb.mxu3 %v651_v46  ;;  %v636_v7 = vmul.f32 %v3343_v43, %v565_v0  ;;  %v637_v13 = vmul.f32 %v3343_v43, %v574_v4  ;;  %v646_v10 = vsel %vm535_vm15, %v3287_v52, %v638_v3  ;;  %vm680_vm4 = vcmask 261120  }
  0xcd   : > { %v2754_v47 = vpop.eup %2753  ;;  %v595_v56 = vmul.f32 0.6931472, %v2752_v49  ;;  %vm534_vm5 = vcmp.gt.f32.partialorder %v3273_v39, 20.0  ;;  %v2640_v39 = vld [vmem:[%s4603_s6 + $0xb0] sm:$0xff] }
  0xce   : > { %v604_v60 = vmul.f32 0.6931472, %v2754_v47  ;;  %v644_v59 = vsel %vm533_vm3, %v3265_v35, %v636_v7  ;;  %v645_v52 = vsel %vm534_vm5, %v3267_v37, %v637_v13  ;;  %v2623_v35 = vld [vmem:[%s4603_s6 + $0x88] sm:$0xff]  ;;  %v654_v37 = vld [vmem:[%s4602_s5 + $0x10] sm:$0xff] }
  0xcf   : > { %v601_v62 = vsel %vm600_vm10, %v598_v48, %v595_v56  ;;  %1667 = vperm.xlu2 %2720, %v2606_v38  }
  0xd0   : > { %v640_v55 = vmul.f32 %v3343_v43, %v601_v62  ;;  %v610_v1 = vsel %vm609_vm11, %v607_v54, %v604_v60  ;;  %v673_v40 = vpop.permute.xlu2 %672 }
  0xd1   : > { %v641_v15 = vmul.f32 %v3343_v43, %v610_v1 }
  0xd2   : > { %v648_v6 = vsel %vm537_vm13, %v3312_v9, %v640_v55  ;;  %v647_v9 = vsel %vm536_vm2, %v3294_v57, %v639_v63  ;;  %v653_v57 = vld [vmem:[%s4602_s5 + $0x8] sm:$0xff] }
  0xd3   : > { %706 = vmatpush.msrb.mxu2 %v648_v6  ;;  %v649_v8 = vsel %vm538_vm14, %v3314_v12, %v641_v15  ;;  %v2340_v12 = vld [vmem:[#allocation2] sm:$0x1] }
  0xd4   : > { %735 = vmatpush.msrb.mxu3 %v649_v8 }
  0xd5   : > { %707 = vmatpush.msrb.mxu2 %v646_v10 }
  0xd6   : > { %736 = vmatpush.msrb.mxu3 %v647_v9 }
  0xd7   : > { %708 = vmatpush.msrb.mxu2 %v644_v59  ;;  %1900 = vperm.xlu2 %2720, %v2623_v35  }
  0xd8   : > { %737 = vmatpush.msrb.mxu3 %v645_v52  ;;  %2540 = vmatmul.msk.f32.vlgmr.msrb.gmra.mxu2 %vm680_vm4, %v652_v16 }
  0xd9   : > { %2544 = vmatmul.msk.f32.vlgmr.msrb.gmra.mxu3 %vm680_vm4, %v652_v16 }
  0xdf   : > { %2133 = vperm.xlu2 %2720, %v2640_v39  }
  0xe0   : > { %2541 = vmatmul.msk.f32.gmra.mxu2 %vm680_vm4, %v653_v57 }
  0xe1   : > { %2545 = vmatmul.msk.f32.gmra.mxu3 %vm680_vm4, %v653_v57 }
  0xe7   : > { %2343 = vperm.xlu2 %2720, %v2340_v12  }
  0xe8   : > { %2542 = vmatmul.msk.f32.gmra.mxu2 %vm680_vm4, %v654_v37 }
  0xe9   : > { %2546 = vmatmul.msk.f32.gmra.mxu3 %vm680_vm4, %v654_v37 }
  0xf0   : > { %2543 = vmatmul.msk.f32.gmra.mxu2 %vm680_vm4, %v655_v61 }
  0xf1   : > { %2547 = vmatmul.msk.f32.gmra.mxu3 %vm680_vm4, %v655_v61 }
 0x15b   : > { %v710_v11 = vpop.f32.mrf.mxu2 }
 0x15c   : > { %v739_v14 = vpop.f32.mrf.mxu3  ;;  %v3437_v18 = vadd.f32 %v710_v11, %v663_v17 }
 0x15d   : > { %v3439_v21 = vadd.f32 %v739_v14, %v663_v17 }
 0x15e   : > { %v3442_v20 = vmul.f32 100.0, %v3437_v18 }
 0x15f   : > { %v3447_v27 = vmul.f32 100.0, %v3439_v21 }
 0x160   : > { %v759_v30 = vmin.f32 %v3442_v20, 20.0 }
 0x161   : > { %v760_v33 = vmin.f32 %v3447_v27, 20.0 }
 0x162   : > { %v775_v34 = vmul.f32 1.442695, %v759_v30 }
 0x163   : > { %v713_v23 = vpop.f32.mrf.mxu2  ;;  %v777_v45 = vmul.f32 1.442695, %v760_v33 }
 0x164   : > { %v3444_v25 = vadd.f32 %v713_v23, %v668_v22  ;;  %v742_v26 = vpop.f32.mrf.mxu3  ;;  %2755 = vpow2.f32 %v775_v34 }
 0x165   : > { %v3449_v29 = vadd.f32 %v742_v26, %v668_v22  ;;  %2757 = vpow2.f32 %v777_v45 }
 0x166   : > { %v3453_v31 = vmul.f32 100.0, %v3444_v25 }
 0x167   : > { %v3456_v32 = vmul.f32 100.0, %v3449_v29 }
 0x168   : > { %v761_v36 = vmin.f32 %v3453_v31, 20.0  ;;  %vm769_vm5 = vcmp.gt.f32.partialorder %v3453_v31, 20.0 }
 0x169   : > { %v762_v41 = vmin.f32 %v3456_v32, 20.0 }
 0x16a   : > { %v779_v53 = vmul.f32 1.442695, %v761_v36  ;;  %v3473_v60 = vpop.eup %2755 }
 0x16b   : > { %v716_v46 = vpop.f32.mrf.mxu2  ;;  %v781_v58 = vmul.f32 1.442695, %v762_v41  ;;  %v3482_v55 = vpop.eup %2757  ;;  %v791_v3 = vadd.f32 1.0, %v3473_v60  ;;  %v794_v38 = vmul.f32 -0.5, %v3473_v60  ;;  %v797_v23 = vand.u32 2147483647, %v3473_v60 }
 0x16c   : > { %v3461_v51 = vadd.f32 %v716_v46, %v673_v40  ;;  %v745_v44 = vpop.f32.mrf.mxu3  ;;  %2759 = vpow2.f32 %v779_v53  ;;  %v800_v8 = vadd.f32 1.0, %v3482_v55  ;;  %v803_v57 = vmul.f32 -0.5, %v3482_v55 }
 0x16d   : > { %v3463_v49 = vadd.f32 %v745_v44, %v673_v40  ;;  %2761 = vpow2.f32 %v781_v58  ;;  %v795_v22 = vadd.f32 1.0, %v794_v38  ;;  %v806_v36 = vand.u32 2147483647, %v3482_v55 }
 0x16e   : > { %v3466_v50 = vmul.f32 100.0, %v3461_v51  ;;  %v804_v34 = vadd.f32 1.0, %v803_v57  ;;  %vm3519_vm7 = vcmp.lt.f32.partialorder %v797_v23, 0.0004427343 }
 0x16f   : > { %v3469_v5 = vmul.f32 100.0, %v3463_v49  ;;  %vm3525_vm8 = vcmp.lt.f32.partialorder %v806_v36, 0.0004427343 }
 0x170   : > { %v763_v47 = vmin.f32 %v3466_v50, 20.0  ;;  %vm771_vm2 = vcmp.gt.f32.partialorder %v3466_v50, 20.0 }
 0x171   : > { %v764_v56 = vmin.f32 %v3469_v5, 20.0  ;;  %vm772_vm3 = vcmp.gt.f32.partialorder %v3469_v5, 20.0 }
 0x172   : > { %v783_v48 = vmul.f32 1.442695, %v763_v47  ;;  %v3488_v4 = vpop.eup %2759 }
 0x173   : > { %v785_v24 = vmul.f32 1.442695, %v764_v56  ;;  %v719_v42 = vpop.f32.mrf.mxu2  ;;  %v3491_v63 = vpop.eup %2761  ;;  %v809_v59 = vadd.f32 1.0, %v3488_v4  ;;  %v812_v37 = vmul.f32 -0.5, %v3488_v4  ;;  %v815_v39 = vand.u32 2147483647, %v3488_v4 }
 0x174   : > { %2763 = vpow2.f32 %v783_v48  ;;  %v3475_v54 = vadd.f32 %v719_v42, %v678_v19  ;;  %v748_v28 = vpop.f32.mrf.mxu3  ;;  %v818_v52 = vadd.f32 1.0, %v3491_v63  ;;  %v821_v11 = vmul.f32 -0.5, %v3491_v63 }
 0x175   : > { %2765 = vpow2.f32 %v785_v24  ;;  %v3477_v62 = vadd.f32 %v748_v28, %v678_v19  ;;  %v813_v46 = vadd.f32 1.0, %v812_v37  ;;  %vm3512_vm6 = vcmp.lt.f32.partialorder %v815_v39, 0.0004427343 }
 0x176   : > { %v3480_v0 = vmul.f32 100.0, %v3475_v54  ;;  %2767 = vlog2.f32 %v791_v3  ;;  %v822_v58 = vadd.f32 1.0, %v821_v11  ;;  %v824_v47 = vand.u32 2147483647, %v3491_v63 }
 0x177   : > { %v3485_v1 = vmul.f32 100.0, %v3477_v62  ;;  %v796_v28 = vmul.f32 %v3473_v60, %v795_v22  ;;  %v814_v60 = vmul.f32 %v3488_v4, %v813_v46 }
 0x178   : > { %v765_v15 = vmin.f32 %v3480_v0, 20.0  ;;  %v823_v37 = vmul.f32 %v3491_v63, %v822_v58  ;;  %vm3541_vm13 = vcmp.lt.f32.partialorder %v824_v47, 0.0004427343  ;;  %vm773_vm14 = vcmp.gt.f32.partialorder %v3480_v0, 20.0 }
 0x179   : > { %v766_v6 = vmin.f32 %v3485_v1, 20.0  ;;  %vm774_vm15 = vcmp.gt.f32.partialorder %v3485_v1, 20.0 }
 0x17a   : > { %v3494_v7 = vpop.eup %2763  ;;  %v787_v2 = vmul.f32 1.442695, %v765_v15 }
 0x17b   : > { %v3497_v13 = vpop.eup %2765  ;;  %v789_v10 = vmul.f32 1.442695, %v766_v6  ;;  %v827_v9 = vadd.f32 1.0, %v3494_v7  ;;  %v830_v12 = vmul.f32 -0.5, %v3494_v7  ;;  %v833_v48 = vand.u32 2147483647, %v3494_v7 }
 0x17c   : > { %2769 = vpow2.f32 %v787_v2  ;;  %v836_v16 = vadd.f32 1.0, %v3497_v13  ;;  %v2768_v35 = vpop.eup %2767  ;;  %v839_v19 = vmul.f32 -0.5, %v3497_v13 }
 0x17d   : > { %2771 = vpow2.f32 %v789_v10  ;;  %v831_v53 = vadd.f32 1.0, %v830_v12  ;;  %v793_v42 = vmul.f32 0.6931472, %v2768_v35  ;;  %v805_v10 = vmul.f32 %v3482_v55, %v804_v34 }
 0x17e   : > { %2773 = vlog2.f32 %v800_v8  ;;  %v840_v24 = vadd.f32 1.0, %v839_v19  ;;  %v842_v8 = vand.u32 2147483647, %v3497_v13  ;;  %vm3532_vm9 = vcmp.lt.f32.partialorder %v833_v48, 0.0004427343 }
 0x17f   : > { %2775 = vlog2.f32 %v827_v9  ;;  %v832_v57 = vmul.f32 %v3494_v7, %v831_v53  ;;  %v799_v46 = vsel %vm3519_vm7, %v796_v28, %v793_v42  ;;  %vm767_vm7 = vcmp.gt.f32.partialorder %v3442_v20, 20.0  ;;  %v2549_v20 = vld [vmem:[%s4602_s5 + $0x28] sm:$0xff]  ;;  %v897_v42 = vpop.permute.xlu1 %896 }
 0x180   : > { %2777 = vlog2.f32 %v836_v16  ;;  %v841_v55 = vmul.f32 %v3497_v13, %v840_v24  ;;  %vm843_vm10 = vcmp.lt.f32.partialorder %v842_v8, 0.0004427343 }
 0x181   : > { %2779 = vlog2.f32 %v809_v59 }
 0x182   : > { %v2770_v61 = vpop.eup %2769  ;;  %2781 = vlog2.f32 %v818_v52 }
 0x183   : > { %v2772_v14 = vpop.eup %2771  ;;  %v845_v17 = vadd.f32 1.0, %v2770_v61  ;;  %v848_v30 = vmul.f32 -0.5, %v2770_v61  ;;  %v851_v16 = vand.u32 2147483647, %v2770_v61 }
 0x184   : > { %v2774_v26 = vpop.eup %2773  ;;  %v854_v33 = vadd.f32 1.0, %v2772_v14  ;;  %v857_v41 = vmul.f32 -0.5, %v2772_v14  ;;  %v860_v38 = vand.u32 2147483647, %v2772_v14 }
 0x185   : > { %v2776_v40 = vpop.eup %2775  ;;  %2783 = vlog2.f32 %v845_v17  ;;  %v849_v6 = vadd.f32 1.0, %v848_v30  ;;  %v802_v17 = vmul.f32 0.6931472, %v2774_v26  ;;  %vm852_vm11 = vcmp.lt.f32.partialorder %v851_v16, 0.0004427343 }
 0x186   : > { %v2778_v45 = vpop.eup %2777  ;;  %2785 = vlog2.f32 %v854_v33  ;;  %v829_v2 = vmul.f32 0.6931472, %v2776_v40  ;;  %v858_v59 = vadd.f32 1.0, %v857_v41  ;;  %vm861_vm12 = vcmp.lt.f32.partialorder %v860_v38, 0.0004427343 }
 0x187   : > { %v2780_v56 = vpop.eup %2779  ;;  %v838_v52 = vmul.f32 0.6931472, %v2778_v45  ;;  %v850_v23 = vmul.f32 %v2770_v61, %v849_v6  ;;  %v808_v53 = vsel %vm3525_vm8, %v805_v10, %v802_v17  ;;  %vm768_vm8 = vcmp.gt.f32.partialorder %v3447_v27, 20.0 }
 0x188   : > { %v2782_v15 = vpop.eup %2781  ;;  %v811_v35 = vmul.f32 0.6931472, %v2780_v56  ;;  %v835_v4 = vsel %vm3532_vm9, %v832_v57, %v829_v2  ;;  %v859_v30 = vmul.f32 %v2772_v14, %v858_v59  ;;  %v864_v56 = vmul.f32 %v808_v53, %v3343_v43 }
 0x189   : > { %v820_v11 = vmul.f32 0.6931472, %v2782_v15  ;;  %v844_v63 = vsel %vm843_vm10, %v841_v55, %v838_v52  ;;  %v867_v36 = vmul.f32 %v835_v4, %v3343_v43 }
 0x18a   : > { %v817_v34 = vsel %vm3512_vm6, %v814_v60, %v811_v35  ;;  %v868_v41 = vmul.f32 %v844_v63, %v3343_v43  ;;  %vm770_vm6 = vcmp.gt.f32.partialorder %v3456_v32, 20.0  ;;  %v872_v31 = vsel %vm768_vm8, %v3439_v21, %v864_v56  ;;  %v2551_v21 = vld [vmem:[%s4602_s5 + $0x38] sm:$0xff]  ;;  %v902_v60 = vpop.permute.xlu0 %901 }
 0x18b   : > { %v2784_v39 = vpop.eup %2783  ;;  %v826_v40 = vsel %vm3541_vm13, %v823_v37, %v820_v11  ;;  %v865_v45 = vmul.f32 %v817_v34, %v3343_v43  ;;  %v875_v47 = vsel %vm771_vm2, %v3461_v51, %v867_v36  ;;  %v2548_v51 = vld [vmem:[%s4602_s5 + $0x20] sm:$0xff] }
 0x18c   : > { %v2786_v19 = vpop.eup %2785  ;;  %v847_v22 = vmul.f32 0.6931472, %v2784_v39  ;;  %v866_v0 = vmul.f32 %v826_v40, %v3343_v43  ;;  %v876_v1 = vsel %vm772_vm3, %v3463_v49, %v868_v41 }
 0x18d   : > { %v856_v7 = vmul.f32 0.6931472, %v2786_v19 }
 0x18e   : > { %v853_v33 = vsel %vm852_vm11, %v850_v23, %v847_v22  ;;  %v874_v50 = vsel %vm770_vm6, %v3449_v29, %v866_v0 }
 0x18f   : > { %v869_v26 = vmul.f32 %v853_v33, %v3343_v43  ;;  %v862_v61 = vsel %vm861_vm12, %v859_v30, %v856_v7 }
 0x190   : > { %v870_v14 = vmul.f32 %v862_v61, %v3343_v43 }
 0x191   : > { %v877_v44 = vsel %vm773_vm14, %v3475_v54, %v869_v26  ;;  %v863_v54 = vmul.f32 %v799_v46, %v3343_v43 }
 0x192   : > { %933 = vmatpush.msrb.mxu0 %v877_v44  ;;  %v878_v58 = vsel %vm774_vm15, %v3477_v62, %v870_v14  ;;  %v873_v62 = vsel %vm769_vm5, %v3444_v25, %v865_v45  ;;  %v907_v25 = vpop.permute.xlu2 %906 }
 0x193   : > { %962 = vmatpush.msrb.mxu1 %v878_v58  ;;  %v871_v49 = vsel %vm767_vm7, %v3437_v18, %v863_v54  ;;  %v2550_v18 = vld [vmem:[%s4602_s5 + $0x30] sm:$0xff] }
 0x194   : > { %934 = vmatpush.msrb.mxu0 %v875_v47 }
 0x195   : > { %963 = vmatpush.msrb.mxu1 %v876_v1 }
 0x196   : > { %935 = vmatpush.msrb.mxu0 %v873_v62 }
 0x197   : > { %964 = vmatpush.msrb.mxu1 %v874_v50 }
 0x198   : > { %936 = vmatpush.msrb.mxu0 %v871_v49 }
 0x199   : > { %965 = vmatpush.msrb.mxu1 %v872_v31  ;;  %2556 = vmatmul.msk.f32.vlgmr.msrb.gmra.mxu0 %vm680_vm4, %v2548_v51 }
 0x19a   : > { %2560 = vmatmul.msk.f32.vlgmr.msrb.gmra.mxu1 %vm680_vm4, %v2548_v51  ;;  %v892_v32 = vpop.permute.xlu2 %891 }
 0x1a1   : > { %2557 = vmatmul.msk.f32.gmra.mxu0 %vm680_vm4, %v2549_v20 }
 0x1a2   : > { %2561 = vmatmul.msk.f32.gmra.mxu1 %vm680_vm4, %v2549_v20 }
 0x1a9   : > { %2558 = vmatmul.msk.f32.gmra.mxu0 %vm680_vm4, %v2550_v18 }
 0x1aa   : > { %2562 = vmatmul.msk.f32.gmra.mxu1 %vm680_vm4, %v2550_v18 }
 0x1b1   : > { %2559 = vmatmul.msk.f32.gmra.mxu0 %vm680_vm4, %v2551_v21 }
 0x1b2   : > { %2563 = vmatmul.msk.f32.gmra.mxu1 %vm680_vm4, %v2551_v21 }
 0x216   : > { %v938_v27 = vpop.f32.mrf.mxu0 }
 0x217   : > { %v967_v29 = vpop.f32.mrf.mxu1  ;;  %v3595_v5 = vadd.f32 %v938_v27, %v892_v32 }
 0x218   : > { %v3597_v48 = vadd.f32 %v967_v29, %v892_v32 }
 0x219   : > { %v3600_v24 = vmul.f32 100.0, %v3595_v5 }
 0x21a   : > { %v3605_v6 = vmul.f32 100.0, %v3597_v48 }
 0x21b   : > { %v987_v8 = vmin.f32 %v3600_v24, 20.0 }
 0x21c   : > { %v988_v16 = vmin.f32 %v3605_v6, 20.0 }
 0x21d   : > { %v1003_v59 = vmul.f32 1.442695, %v987_v8 }
 0x21e   : > { %v941_v28 = vpop.f32.mrf.mxu0  ;;  %v1005_v39 = vmul.f32 1.442695, %v988_v16 }
 0x21f   : > { %v3602_v3 = vadd.f32 %v941_v28, %v897_v42  ;;  %v970_v15 = vpop.f32.mrf.mxu1  ;;  %2787 = vpow2.f32 %v1003_v59 }
 0x220   : > { %v3607_v2 = vadd.f32 %v970_v15, %v897_v42  ;;  %2789 = vpow2.f32 %v1005_v39 }
 0x221   : > { %v3611_v10 = vmul.f32 100.0, %v3602_v3 }
 0x222   : > { %v3614_v9 = vmul.f32 100.0, %v3607_v2 }
 0x223   : > { %v989_v52 = vmin.f32 %v3611_v10, 20.0  ;;  %vm997_vm8 = vcmp.gt.f32.partialorder %v3611_v10, 20.0 }
 0x224   : > { %v990_v38 = vmin.f32 %v3614_v9, 20.0 }
 0x225   : > { %v1007_v55 = vmul.f32 1.442695, %v989_v52  ;;  %v3631_v63 = vpop.eup %2787 }
 0x226   : > { %v944_v57 = vpop.f32.mrf.mxu0  ;;  %v1009_v17 = vmul.f32 1.442695, %v990_v38  ;;  %v3640_v61 = vpop.eup %2789  ;;  %v1019_v40 = vadd.f32 1.0, %v3631_v63  ;;  %v1022_v50 = vmul.f32 -0.5, %v3631_v63  ;;  %v1025_v28 = vand.u32 2147483647, %v3631_v63 }
 0x227   : > { %v3619_v35 = vadd.f32 %v944_v57, %v902_v60  ;;  %v973_v37 = vpop.f32.mrf.mxu1  ;;  %2791 = vpow2.f32 %v1007_v55  ;;  %v1028_v58 = vadd.f32 1.0, %v3640_v61  ;;  %v1031_v51 = vmul.f32 -0.5, %v3640_v61 }
 0x228   : > { %v3621_v12 = vadd.f32 %v973_v37, %v902_v60  ;;  %2793 = vpow2.f32 %v1009_v17  ;;  %v1023_v42 = vadd.f32 1.0, %v1022_v50  ;;  %v1034_v52 = vand.u32 2147483647, %v3640_v61 }
 0x229   : > { %v3624_v11 = vmul.f32 100.0, %v3619_v35  ;;  %v1032_v59 = vadd.f32 1.0, %v1031_v51  ;;  %vm3677_vm10 = vcmp.lt.f32.partialorder %v1025_v28, 0.0004427343 }
 0x22a   : > { %v3627_v19 = vmul.f32 100.0, %v3621_v12  ;;  %vm3683_vm11 = vcmp.lt.f32.partialorder %v1034_v52, 0.0004427343 }
 0x22b   : > { %v991_v22 = vmin.f32 %v3624_v11, 20.0  ;;  %vm999_vm6 = vcmp.gt.f32.partialorder %v3624_v11, 20.0 }
 0x22c   : > { %v992_v23 = vmin.f32 %v3627_v19, 20.0  ;;  %vm1000_vm7 = vcmp.gt.f32.partialorder %v3627_v19, 20.0 }
 0x22d   : > { %v1011_v4 = vmul.f32 1.442695, %v991_v22  ;;  %v3646_v14 = vpop.eup %2791 }
 0x22e   : > { %v1013_v7 = vmul.f32 1.442695, %v992_v23  ;;  %v947_v30 = vpop.f32.mrf.mxu0  ;;  %v3649_v46 = vpop.eup %2793  ;;  %v1037_v56 = vadd.f32 1.0, %v3646_v14  ;;  %v1040_v31 = vmul.f32 -0.5, %v3646_v14  ;;  %v1043_v20 = vand.u32 2147483647, %v3646_v14 }
 0x22f   : > { %2795 = vpow2.f32 %v1011_v4  ;;  %v3633_v33 = vadd.f32 %v947_v30, %v907_v25  ;;  %v976_v34 = vpop.f32.mrf.mxu1  ;;  %v1046_v62 = vadd.f32 1.0, %v3649_v46  ;;  %v1052_v22 = vand.u32 2147483647, %v3649_v46 }
 0x230   : > { %2797 = vpow2.f32 %v1013_v7  ;;  %v3635_v13 = vadd.f32 %v976_v34, %v907_v25  ;;  %v1049_v25 = vmul.f32 -0.5, %v3649_v46  ;;  %v1041_v57 = vadd.f32 1.0, %v1040_v31 }
 0x231   : > { %v3638_v26 = vmul.f32 100.0, %v3633_v33  ;;  %2799 = vlog2.f32 %v1019_v40  ;;  %vm3670_vm9 = vcmp.lt.f32.partialorder %v1043_v20, 0.0004427343  ;;  %v1024_v34 = vmul.f32 %v3631_v63, %v1023_v42 }
 0x232   : > { %v3643_v36 = vmul.f32 100.0, %v3635_v13  ;;  %v1050_v17 = vadd.f32 1.0, %v1049_v25  ;;  %v1042_v63 = vmul.f32 %v3646_v14, %v1041_v57  ;;  %vm3699_vm2 = vcmp.lt.f32.partialorder %v1052_v22, 0.0004427343 }
 0x233   : > { %v993_v41 = vmin.f32 %v3638_v26, 20.0  ;;  %vm1001_vm3 = vcmp.gt.f32.partialorder %v3638_v26, 20.0 }
 0x234   : > { %v994_v44 = vmin.f32 %v3643_v36, 20.0  ;;  %v1051_v31 = vmul.f32 %v3649_v46, %v1050_v17  ;;  %vm1002_vm5 = vcmp.gt.f32.partialorder %v3643_v36, 20.0 }
 0x235   : > { %v3652_v45 = vpop.eup %2795  ;;  %v1015_v53 = vmul.f32 1.442695, %v993_v41 }
 0x236   : > { %v3655_v0 = vpop.eup %2797  ;;  %v1017_v47 = vmul.f32 1.442695, %v994_v44  ;;  %v1055_v54 = vadd.f32 1.0, %v3652_v45  ;;  %v1058_v21 = vmul.f32 -0.5, %v3652_v45  ;;  %v1061_v4 = vand.u32 2147483647, %v3652_v45 }
 0x237   : > { %2801 = vpow2.f32 %v1015_v53  ;;  %v1064_v1 = vadd.f32 1.0, %v3655_v0  ;;  %v2800_v49 = vpop.eup %2799  ;;  %v1067_v32 = vmul.f32 -0.5, %v3655_v0 }
 0x238   : > { %2803 = vpow2.f32 %v1017_v47  ;;  %v1059_v55 = vadd.f32 1.0, %v1058_v21  ;;  %v1021_v30 = vmul.f32 0.6931472, %v2800_v49  ;;  %v1033_v47 = vmul.f32 %v3640_v61, %v1032_v59 }
 0x239   : > { %2805 = vlog2.f32 %v1028_v58  ;;  %v1068_v7 = vadd.f32 1.0, %v1067_v32  ;;  %v1070_v58 = vand.u32 2147483647, %v3655_v0  ;;  %vm3690_vm12 = vcmp.lt.f32.partialorder %v1061_v4, 0.0004427343 }
 0x23a   : > { %2807 = vlog2.f32 %v1055_v54  ;;  %v1060_v51 = vmul.f32 %v3652_v45, %v1059_v55  ;;  %v1027_v57 = vsel %vm3677_vm10, %v1024_v34, %v1021_v30  ;;  %vm995_vm10 = vcmp.gt.f32.partialorder %v3600_v24, 20.0  ;;  %v2565_v24 = vld [vmem:[%s4602_s5 + $0x48] sm:$0xff]  ;;  %v1125_v30 = vpop.permute.xlu2 %1124 }
 0x23b   : > { %2809 = vlog2.f32 %v1064_v1  ;;  %v1069_v61 = vmul.f32 %v3655_v0, %v1068_v7  ;;  %vm1071_vm13 = vcmp.lt.f32.partialorder %v1070_v58, 0.0004427343  ;;  %v1091_v36 = vmul.f32 %v1027_v57, %v3343_v43 }
 0x23c   : > { %2811 = vlog2.f32 %v1037_v56 }
 0x23d   : > { %v2802_v18 = vpop.eup %2801  ;;  %2813 = vlog2.f32 %v1046_v62 }
 0x23e   : > { %v2804_v27 = vpop.eup %2803  ;;  %v1073_v29 = vadd.f32 1.0, %v2802_v18  ;;  %v1076_v8 = vmul.f32 -0.5, %v2802_v18  ;;  %v1079_v1 = vand.u32 2147483647, %v2802_v18 }
 0x23f   : > { %v2806_v15 = vpop.eup %2805  ;;  %v1082_v16 = vadd.f32 1.0, %v2804_v27  ;;  %v1085_v38 = vmul.f32 -0.5, %v2804_v27  ;;  %v1088_v50 = vand.u32 2147483647, %v2804_v27 }
 0x240   : > { %v2808_v60 = vpop.eup %2807  ;;  %2815 = vlog2.f32 %v1073_v29  ;;  %v1077_v44 = vadd.f32 1.0, %v1076_v8  ;;  %v1030_v29 = vmul.f32 0.6931472, %v2806_v15  ;;  %vm1080_vm14 = vcmp.lt.f32.partialorder %v1079_v1, 0.0004427343 }
 0x241   : > { %v2810_v39 = vpop.eup %2809  ;;  %2817 = vlog2.f32 %v1082_v16  ;;  %v1057_v53 = vmul.f32 0.6931472, %v2808_v60  ;;  %v1086_v56 = vadd.f32 1.0, %v1085_v38  ;;  %vm1089_vm15 = vcmp.lt.f32.partialorder %v1088_v50, 0.0004427343 }
 0x242   : > { %v2812_v23 = vpop.eup %2811  ;;  %v1066_v62 = vmul.f32 0.6931472, %v2810_v39  ;;  %v1078_v28 = vmul.f32 %v2802_v18, %v1077_v44  ;;  %v1036_v55 = vsel %vm3683_vm11, %v1033_v47, %v1030_v29  ;;  %vm996_vm11 = vcmp.gt.f32.partialorder %v3605_v6, 20.0 }
 0x243   : > { %v2814_v41 = vpop.eup %2813  ;;  %v1039_v49 = vmul.f32 0.6931472, %v2812_v23  ;;  %v1063_v14 = vsel %vm3690_vm12, %v1060_v51, %v1057_v53  ;;  %v1087_v8 = vmul.f32 %v2804_v27, %v1086_v56  ;;  %v1092_v23 = vmul.f32 %v1036_v55, %v3343_v43 }
 0x244   : > { %v1048_v25 = vmul.f32 0.6931472, %v2814_v41  ;;  %v1072_v46 = vsel %vm1071_vm13, %v1069_v61, %v1066_v62  ;;  %v1095_v52 = vmul.f32 %v1063_v14, %v3343_v43 }
 0x245   : > { %v1045_v59 = vsel %vm3670_vm9, %v1042_v63, %v1039_v49  ;;  %v1096_v38 = vmul.f32 %v1072_v46, %v3343_v43  ;;  %vm998_vm9 = vcmp.gt.f32.partialorder %v3614_v9, 20.0  ;;  %v1100_v10 = vsel %vm996_vm11, %v3597_v48, %v1092_v23  ;;  %v2567_v48 = vld [vmem:[%s4602_s5 + $0x58] sm:$0xff]  ;;  %v1130_v63 = vpop.permute.xlu1 %1129 }
 0x246   : > { %v2816_v20 = vpop.eup %2815  ;;  %v1054_v60 = vsel %vm3699_vm2, %v1051_v31, %v1048_v25  ;;  %v1093_v39 = vmul.f32 %v1045_v59, %v3343_v43  ;;  %v1103_v22 = vsel %vm999_vm6, %v3619_v35, %v1095_v52  ;;  %v2564_v35 = vld [vmem:[%s4602_s5 + $0x40] sm:$0xff] }
 0x247   : > { %v2818_v32 = vpop.eup %2817  ;;  %v1075_v42 = vmul.f32 0.6931472, %v2816_v20  ;;  %v1094_v26 = vmul.f32 %v1054_v60, %v3343_v43  ;;  %v1346_v60 = vld.sshfl [vmem:[#allocation1 + $0x8] sm:$0xff pattern:$0x75316420] }
 0x248   : > { %v1084_v45 = vmul.f32 0.6931472, %v2818_v32  ;;  %2589 = vmatpush.msk.msra.mxu1 %vm454_vm0, %v1346_v60 }
 0x249   : > { %v1081_v16 = vsel %vm1080_vm14, %v1078_v28, %v1075_v42  ;;  %v1102_v11 = vsel %vm998_vm9, %v3607_v2, %v1094_v26 }
 0x24a   : > { %v1097_v15 = vmul.f32 %v1081_v16, %v3343_v43  ;;  %v1090_v18 = vsel %vm1089_vm15, %v1087_v8, %v1084_v45 }
 0x24b   : > { %v1098_v27 = vmul.f32 %v1090_v18, %v3343_v43 }
 0x24c   : > { %v1105_v37 = vsel %vm1001_vm3, %v3633_v33, %v1097_v15  ;;  %v1104_v33 = vsel %vm1000_vm7, %v3621_v12, %v1096_v38  ;;  %v1099_v12 = vsel %vm995_vm10, %v3595_v5, %v1091_v36  ;;  %v2566_v5 = vld [vmem:[%s4602_s5 + $0x50] sm:$0xff]  ;;  %v1340_v36 = vld [vmem:[%s4601_s4] sm:$0xff] }
 0x24d   : > { %1161 = vmatpush.msra.mxu2 %v1105_v37  ;;  %v1106_v17 = vsel %vm1002_vm5, %v3635_v13, %v1098_v27  ;;  %v1101_v13 = vsel %vm997_vm8, %v3602_v3, %v1093_v39  ;;  %v1135_v3 = vpop.permute.xlu0 %1134  ;;  %2590 = vmatmul.msk.f32.vlgmr.msra.gmra.mxu1 %vm441_vm1, %v1340_v36 }
 0x24e   : > { %1190 = vmatpush.msra.mxu3 %v1106_v17 }
 0x24f   : > { %1162 = vmatpush.msra.mxu2 %v1103_v22  ;;  %v1345_v22 = vld.sshfl [vmem:[#allocation1] sm:$0xff pattern:$0x75316420] }
 0x250   : > { %1191 = vmatpush.msra.mxu3 %v1104_v33  ;;  %2584 = vmatpush.msk.msra.mxu0 %vm454_vm0, %v1345_v22 }
 0x251   : > { %1163 = vmatpush.msra.mxu2 %v1101_v13  ;;  %2585 = vmatmul.msk.f32.vlgmr.msra.gmra.mxu0 %vm441_vm1, %v1340_v36 }
 0x252   : > { %1192 = vmatpush.msra.mxu3 %v1102_v11 }
 0x253   : > { %1164 = vmatpush.msra.mxu2 %v1099_v12 }
 0x254   : > { %1193 = vmatpush.msra.mxu3 %v1100_v10  ;;  %2572 = vmatmul.msk.f32.vlgmr.msra.gmra.mxu2 %vm680_vm4, %v2564_v35 }
 0x255   : > { %2576 = vmatmul.msk.f32.vlgmr.msra.gmra.mxu3 %vm680_vm4, %v2564_v35  ;;  %v1120_v9 = vpop.permute.xlu0 %1119 }
 0x25c   : > { %2573 = vmatmul.msk.f32.gmra.mxu2 %vm680_vm4, %v2565_v24 }
 0x25d   : > { %2577 = vmatmul.msk.f32.gmra.mxu3 %vm680_vm4, %v2565_v24 }
 0x264   : > { %2574 = vmatmul.msk.f32.gmra.mxu2 %vm680_vm4, %v2566_v5 }
 0x265   : > { %2578 = vmatmul.msk.f32.gmra.mxu3 %vm680_vm4, %v2566_v5 }
 0x26c   : > { %2575 = vmatmul.msk.f32.gmra.mxu2 %vm680_vm4, %v2567_v48 }
 0x26d   : > { %2579 = vmatmul.msk.f32.gmra.mxu3 %vm680_vm4, %v2567_v48 }
 0x2d7   : > { %v1166_v6 = vpop.f32.mrf.mxu2 }
 0x2d8   : > { %v1195_v2 = vpop.f32.mrf.mxu3  ;;  %v3753_v19 = vadd.f32 %v1166_v6, %v1120_v9 }
 0x2d9   : > { %v3755_v4 = vadd.f32 %v1195_v2, %v1120_v9 }
 0x2da   : > { %v3758_v7 = vmul.f32 100.0, %v3753_v19 }
 0x2db   : > { %v3761_v40 = vmul.f32 100.0, %v3755_v4 }
 0x2dc   : > { %v1215_v58 = vmin.f32 %v3758_v7, 20.0 }
 0x2dd   : > { %v1216_v1 = vmin.f32 %v3761_v40, 20.0 }
 0x2de   : > { %v1231_v56 = vmul.f32 1.442695, %v1215_v58 }
 0x2df   : > { %v1169_v34 = vpop.f32.mrf.mxu2  ;;  %v1233_v49 = vmul.f32 1.442695, %v1216_v1 }
 0x2e0   : > { %v3763_v41 = vadd.f32 %v1169_v34, %v1125_v30  ;;  %v1198_v44 = vpop.f32.mrf.mxu3  ;;  %2819 = vpow2.f32 %v1231_v56 }
 0x2e1   : > { %v3765_v53 = vadd.f32 %v1198_v44, %v1125_v30  ;;  %2821 = vpow2.f32 %v1233_v49  ;;  %v1341_v30 = vld [vmem:[%s4601_s4 + $0x8] sm:$0xff] }
 0x2e2   : > { %v3769_v47 = vmul.f32 100.0, %v3763_v41  ;;  %2591 = vmatmul.msk.f32.gmra.mxu1 %vm441_vm1, %v1341_v30  ;;  %2586 = vmatmul.msk.f32.gmra.mxu0 %vm441_vm1, %v1341_v30 }
 0x2e3   : > { %v3772_v54 = vmul.f32 100.0, %v3765_v53 }
 0x2e4   : > { %v1217_v62 = vmin.f32 %v3769_v47, 20.0  ;;  %vm1225_vm10 = vcmp.gt.f32.partialorder %v3769_v47, 20.0 }
 0x2e5   : > { %v1218_v50 = vmin.f32 %v3772_v54, 20.0  ;;  %vm1226_vm11 = vcmp.gt.f32.partialorder %v3772_v54, 20.0 }
 0x2e6   : > { %v1235_v61 = vmul.f32 1.442695, %v1217_v62  ;;  %v3789_v46 = vpop.eup %2819 }
 0x2e7   : > { %v1172_v51 = vpop.f32.mrf.mxu2  ;;  %v1237_v29 = vmul.f32 1.442695, %v1218_v50  ;;  %v3795_v15 = vpop.eup %2821  ;;  %v1247_v27 = vadd.f32 1.0, %v3789_v46  ;;  %v1250_v10 = vmul.f32 -0.5, %v3789_v46  ;;  %v1253_v56 = vand.u32 2147483647, %v3789_v46 }
 0x2e8   : > { %v3777_v31 = vadd.f32 %v1172_v51, %v1130_v63  ;;  %v1201_v20 = vpop.f32.mrf.mxu3  ;;  %2823 = vpow2.f32 %v1235_v61  ;;  %v1256_v55 = vadd.f32 1.0, %v3795_v15  ;;  %v1259_v24 = vmul.f32 -0.5, %v3795_v15 }
 0x2e9   : > { %v3779_v21 = vadd.f32 %v1201_v20, %v1130_v63  ;;  %2825 = vpow2.f32 %v1237_v29  ;;  %v1251_v1 = vadd.f32 1.0, %v1250_v10  ;;  %v1262_v49 = vand.u32 2147483647, %v3795_v15 }
 0x2ea   : > { %v3782_v25 = vmul.f32 100.0, %v3777_v31  ;;  %v1260_v51 = vadd.f32 1.0, %v1259_v24  ;;  %vm3847_vm12 = vcmp.lt.f32.partialorder %v1253_v56, 0.0004427343 }
 0x2eb   : > { %v3785_v32 = vmul.f32 100.0, %v3779_v21  ;;  %vm3853_vm13 = vcmp.lt.f32.partialorder %v1262_v49, 0.0004427343 }
 0x2ec   : > { %v1219_v42 = vmin.f32 %v3782_v25, 20.0  ;;  %vm1227_vm8 = vcmp.gt.f32.partialorder %v3782_v25, 20.0 }
 0x2ed   : > { %v1220_v28 = vmin.f32 %v3785_v32, 20.0  ;;  %vm1228_vm9 = vcmp.gt.f32.partialorder %v3785_v32, 20.0 }
 0x2ee   : > { %v1239_v14 = vmul.f32 1.442695, %v1219_v42  ;;  %v3804_v38 = vpop.eup %2823 }
 0x2ef   : > { %v1241_v45 = vmul.f32 1.442695, %v1220_v28  ;;  %v1175_v8 = vpop.f32.mrf.mxu2  ;;  %v3808_v37 = vpop.eup %2825  ;;  %v1265_v35 = vadd.f32 1.0, %v3804_v38  ;;  %v1268_v48 = vmul.f32 -0.5, %v3804_v38 }
 0x2f0   : > { %2827 = vpow2.f32 %v1239_v14  ;;  %v3791_v16 = vadd.f32 %v1175_v8, %v1135_v3  ;;  %v1204_v59 = vpop.f32.mrf.mxu3  ;;  %v1274_v12 = vadd.f32 1.0, %v3808_v37  ;;  %v1277_v9 = vmul.f32 -0.5, %v3808_v37 }
 0x2f1   : > { %2829 = vpow2.f32 %v1241_v45  ;;  %v3793_v0 = vadd.f32 %v1204_v59, %v1135_v3  ;;  %v1271_v3 = vand.u32 2147483647, %v3804_v38  ;;  %v1269_v29 = vadd.f32 1.0, %v1268_v48 }
 0x2f2   : > { %v3798_v18 = vmul.f32 100.0, %v3791_v16  ;;  %2831 = vlog2.f32 %v1247_v27  ;;  %v1278_v45 = vadd.f32 1.0, %v1277_v9  ;;  %v1280_v8 = vand.u32 2147483647, %v3808_v37 }
 0x2f3   : > { %v3801_v52 = vmul.f32 100.0, %v3793_v0  ;;  %vm3840_vm0 = vcmp.lt.f32.partialorder %v1271_v3, 0.0004427343 }
 0x2f4   : > { %v1221_v57 = vmin.f32 %v3798_v18, 20.0  ;;  %v1279_v3 = vmul.f32 %v3808_v37, %v1278_v45  ;;  %vm3880_vm5 = vcmp.lt.f32.partialorder %v1280_v8, 0.0004427343  ;;  %vm1229_vm6 = vcmp.gt.f32.partialorder %v3798_v18, 20.0 }
 0x2f5   : > { %v1222_v39 = vmin.f32 %v3801_v52, 20.0  ;;  %vm1230_vm7 = vcmp.gt.f32.partialorder %v3801_v52, 20.0 }
 0x2f6   : > { %v3812_v17 = vpop.eup %2827  ;;  %v1243_v26 = vmul.f32 1.442695, %v1221_v57 }
 0x2f7   : > { %v3817_v33 = vpop.eup %2829  ;;  %v1245_v23 = vmul.f32 1.442695, %v1222_v39  ;;  %v1283_v13 = vadd.f32 1.0, %v3812_v17  ;;  %v1286_v2 = vmul.f32 -0.5, %v3812_v17  ;;  %v1289_v60 = vand.u32 2147483647, %v3812_v17 }
 0x2f8   : > { %2833 = vpow2.f32 %v1243_v26  ;;  %v1292_v11 = vadd.f32 1.0, %v3817_v33  ;;  %v2832_v5 = vpop.eup %2831  ;;  %v1295_v58 = vmul.f32 -0.5, %v3817_v33  ;;  %v1252_v39 = vmul.f32 %v3789_v46, %v1251_v1 }
 0x2f9   : > { %2835 = vpow2.f32 %v1245_v23  ;;  %v1287_v14 = vadd.f32 1.0, %v1286_v2  ;;  %v1249_v57 = vmul.f32 0.6931472, %v2832_v5  ;;  %v1298_v23 = vand.u32 2147483647, %v3817_v33  ;;  %v1342_v2 = vld [vmem:[%s4601_s4 + $0x10] sm:$0xff] }
 0x2fa   : > { %2837 = vlog2.f32 %v1256_v55  ;;  %v1296_v27 = vadd.f32 1.0, %v1295_v58  ;;  %v1270_v46 = vmul.f32 %v3804_v38, %v1269_v29  ;;  %vm3863_vm14 = vcmp.lt.f32.partialorder %v1289_v60, 0.0004427343  ;;  %2592 = vmatmul.msk.f32.gmra.mxu1 %vm441_vm1, %v1342_v2  ;;  %2587 = vmatmul.msk.f32.gmra.mxu0 %vm441_vm1, %v1342_v2  ;;  %v1343_v60 = vld [vmem:[%s4601_s4 + $0x18] sm:$0xff] }
 0x2fb   : > { %2839 = vlog2.f32 %v1283_v13  ;;  %v1261_v13 = vmul.f32 %v3795_v15, %v1260_v51  ;;  %v1288_v5 = vmul.f32 %v3812_v17, %v1287_v14  ;;  %vm3871_vm15 = vcmp.lt.f32.partialorder %v1298_v23, 0.0004427343 }
 0x2fc   : > { %2841 = vlog2.f32 %v1292_v11  ;;  %v1297_v30 = vmul.f32 %v3817_v33, %v1296_v27  ;;  %v1255_v42 = vsel %vm3847_vm12, %v1252_v39, %v1249_v57  ;;  %vm1224_vm12 = vcmp.gt.f32.partialorder %v3761_v40, 20.0  ;;  %v1380_v40 = vpop.f32.mrf.mxu0 }
 0x2fd   : > { %2843 = vlog2.f32 %v1265_v35 }
 0x2fe   : > { %v2834_v6 = vpop.eup %2833  ;;  %2845 = vlog2.f32 %v1274_v12 }
 0x2ff   : > { %v2836_v34 = vpop.eup %2835  ;;  %v1301_v44 = vadd.f32 1.0, %v2834_v6  ;;  %v1304_v63 = vmul.f32 -0.5, %v2834_v6  ;;  %v1307_v35 = vand.u32 2147483647, %v2834_v6 }
 0x300   : > { %v2838_v62 = vpop.eup %2837  ;;  %v1310_v50 = vadd.f32 1.0, %v2836_v34  ;;  %v1313_v61 = vmul.f32 -0.5, %v2836_v34  ;;  %v1316_v24 = vand.u32 2147483647, %v2836_v34 }
 0x301   : > { %v2840_v20 = vpop.eup %2839  ;;  %2847 = vlog2.f32 %v1301_v44  ;;  %v1305_v22 = vadd.f32 1.0, %v1304_v63  ;;  %v1258_v58 = vmul.f32 0.6931472, %v2838_v62  ;;  %vm1308_vm2 = vcmp.lt.f32.partialorder %v1307_v35, 0.0004427343 }
 0x302   : > { %v2842_v28 = vpop.eup %2841  ;;  %2849 = vlog2.f32 %v1310_v50  ;;  %v1285_v36 = vmul.f32 0.6931472, %v2840_v20  ;;  %v1314_v12 = vadd.f32 1.0, %v1313_v61  ;;  %vm1317_vm3 = vcmp.lt.f32.partialorder %v1316_v24, 0.0004427343  ;;  %2593 = vmatmul.msk.f32.gmra.mxu1 %vm441_vm1, %v1343_v60  ;;  %2588 = vmatmul.msk.f32.gmra.mxu0 %vm441_vm1, %v1343_v60 }
 0x303   : > { %v2844_v59 = vpop.eup %2843  ;;  %v1294_v10 = vmul.f32 0.6931472, %v2842_v28  ;;  %v1306_v1 = vmul.f32 %v2834_v6, %v1305_v22  ;;  %v1264_v8 = vsel %vm3853_vm13, %v1261_v13, %v1258_v58 }
 0x304   : > { %v2846_v26 = vpop.eup %2845  ;;  %v1267_v48 = vmul.f32 0.6931472, %v2844_v59  ;;  %v1291_v37 = vsel %vm3863_vm14, %v1288_v5, %v1285_v36  ;;  %v1315_v50 = vmul.f32 %v2836_v34, %v1314_v12  ;;  %v1320_v25 = vmul.f32 %v1264_v8, %v3343_v43 }
 0x305   : > { %v1276_v44 = vmul.f32 0.6931472, %v2846_v26  ;;  %v1300_v33 = vsel %vm3871_vm15, %v1297_v30, %v1294_v10  ;;  %v1323_v61 = vmul.f32 %v1291_v37, %v3343_v43 }
 0x306   : > { %v1273_v6 = vsel %vm3840_vm0, %v1270_v46, %v1267_v48  ;;  %v1324_v28 = vmul.f32 %v1300_v33, %v3343_v43  ;;  %vm1223_vm0 = vcmp.gt.f32.partialorder %v3758_v7, 20.0  ;;  %v1328_v32 = vsel %vm1224_vm12, %v3755_v4, %v1320_v25  ;;  %v2581_v7 = vld [vmem:[%s4602_s5 + $0x68] sm:$0xff]  ;;  %v2583_v4 = vld [vmem:[%s4602_s5 + $0x78] sm:$0xff] }
 0x307   : > { %v2848_v15 = vpop.eup %2847  ;;  %v1282_v34 = vsel %vm3880_vm5, %v1279_v3, %v1276_v44  ;;  %v1321_v45 = vmul.f32 %v1273_v6, %v3343_v43  ;;  %v1331_v52 = vsel %vm1227_vm8, %v3777_v31, %v1323_v61  ;;  %v1507_v3 = vpop.permute.xlu0 %1506 }
 0x308   : > { %v2850_v38 = vpop.eup %2849  ;;  %v1303_v17 = vmul.f32 0.6931472, %v2848_v15  ;;  %v1322_v18 = vmul.f32 %v1282_v34, %v3343_v43 }
 0x309   : > { %v1312_v63 = vmul.f32 0.6931472, %v2850_v38  ;;  %v1329_v27 = vsel %vm1225_vm10, %v3763_v41, %v1321_v45  ;;  %v1409_v41 = vpop.f32.mrf.mxu1 }
 0x30a   : > { %v1309_v62 = vsel %vm1308_vm2, %v1306_v1, %v1303_v17  ;;  %v1330_v31 = vsel %vm1226_vm11, %v3765_v53, %v1322_v18  ;;  %v3939_v53 = vpop.permute.xlu1 %1516 }
 0x30b   : > { %v1325_v49 = vmul.f32 %v1309_v62, %v3343_v43  ;;  %v1318_v20 = vsel %vm1317_vm3, %v1315_v50, %v1312_v63 }
 0x30c   : > { %v1326_v29 = vmul.f32 %v1318_v20, %v3343_v43 }
 0x30d   : > { %v1333_v14 = vsel %vm1229_vm6, %v3791_v16, %v1325_v49  ;;  %v1319_v16 = vmul.f32 %v1255_v42, %v3343_v43  ;;  %v1512_v49 = vpop.permute.xlu2 %1511 }
 0x30e   : > { %1445 = vmatpush.msrb.mxu2 %v1333_v14  ;;  %v1334_v59 = vsel %vm1230_vm7, %v3793_v0, %v1326_v29  ;;  %v1332_v0 = vsel %vm1228_vm9, %v3779_v21, %v1324_v28  ;;  %v2580_v21 = vld [vmem:[%s4602_s5 + $0x60] sm:$0xff] }
 0x30f   : > { %1474 = vmatpush.msrb.mxu3 %v1334_v59  ;;  %v1327_v47 = vsel %vm1223_vm0, %v3753_v19, %v1319_v16  ;;  %v2582_v19 = vld [vmem:[%s4602_s5 + $0x70] sm:$0xff] }
 0x310   : > { %1446 = vmatpush.msrb.mxu2 %v1331_v52 }
 0x311   : > { %1475 = vmatpush.msrb.mxu3 %v1332_v0 }
 0x312   : > { %1447 = vmatpush.msrb.mxu2 %v1329_v27  ;;  %v1502_v23 = vpop.permute.xlu1 %1501 }
 0x313   : > { %1476 = vmatpush.msrb.mxu3 %v1330_v31 }
 0x314   : > { %1448 = vmatpush.msrb.mxu2 %v1327_v47 }
 0x315   : > { %1477 = vmatpush.msrb.mxu3 %v1328_v32  ;;  %2594 = vmatmul.msk.f32.vlgmr.msrb.gmra.mxu2 %vm680_vm4, %v2580_v21 }
 0x316   : > { %2598 = vmatmul.msk.f32.vlgmr.msrb.gmra.mxu3 %vm680_vm4, %v2580_v21 }
 0x31d   : > { %2595 = vmatmul.msk.f32.gmra.mxu2 %vm680_vm4, %v2581_v7 }
 0x31e   : > { %2599 = vmatmul.msk.f32.gmra.mxu3 %vm680_vm4, %v2581_v7 }
 0x325   : > { %2596 = vmatmul.msk.f32.gmra.mxu2 %vm680_vm4, %v2582_v19 }
 0x326   : > { %2600 = vmatmul.msk.f32.gmra.mxu3 %vm680_vm4, %v2582_v19 }
 0x32d   : > { %2597 = vmatmul.msk.f32.gmra.mxu2 %vm680_vm4, %v2583_v4 }
 0x32e   : > { %2601 = vmatmul.msk.f32.gmra.mxu3 %vm680_vm4, %v2583_v4 }
 0x35f   : > { %v1383_v26 = vpop.f32.mrf.mxu0  ;;  %v1412_v36 = vpop.f32.mrf.mxu1 }
 0x377   : > { %v1386_v15 = vpop.f32.mrf.mxu0  ;;  %v1415_v30 = vpop.f32.mrf.mxu1 }
 0x37f   : > { %v1389_v42 = vpop.f32.mrf.mxu0  ;;  %v1418_v8 = vpop.f32.mrf.mxu1 }
 0x398   : > { %v1450_v54 = vpop.f32.mrf.mxu2 }
 0x399   : > { %v1451_v57 = vadd.f32 %v1450_v54, %v1380_v40  ;;  %v1479_v39 = vpop.f32.mrf.mxu3 }
 0x39a   : > { %v1480_v55 = vadd.f32 %v1479_v39, %v1409_v41 }
 0x39b   : > { %v1491_v22 = vmul.f32 0.70710677, %v1451_v57 }
 0x39c   : > { %v1492_v13 = vmul.f32 0.70710677, %v1480_v55 }
 0x39d   : > { %v3941_v11 = vadd.f32 %v1502_v23, %v1491_v22 }
 0x39e   : > { %v3943_v46 = vadd.f32 %v1502_v23, %v1492_v13 }
 0x39f   : > { %v3946_v5 = vmul.f32 100.0, %v3941_v11 }
 0x3a0   : > { %v1453_v35 = vpop.f32.mrf.mxu2  ;;  %v3951_v44 = vmul.f32 100.0, %v3943_v46 }
 0x3a1   : > { %v1454_v12 = vadd.f32 %v1453_v35, %v1383_v26  ;;  %v1482_v10 = vpop.f32.mrf.mxu3  ;;  %v1535_v38 = vmin.f32 %v3946_v5, 20.0  ;;  %vm1543_vm12 = vcmp.gt.f32.partialorder %v3946_v5, 20.0  ;;  %v2603_v5 = vld [vmem:[%s4602_s5 + $0x88] sm:$0xff] }
 0x3a2   : > { %v1483_v24 = vadd.f32 %v1482_v10, %v1412_v36  ;;  %v1536_v50 = vmin.f32 %v3951_v44, 20.0 }
 0x3a3   : > { %v1493_v48 = vmul.f32 0.70710677, %v1454_v12  ;;  %v1551_v62 = vmul.f32 1.442695, %v1535_v38 }
 0x3a4   : > { %v1494_v2 = vmul.f32 0.70710677, %v1483_v24  ;;  %v1553_v29 = vmul.f32 1.442695, %v1536_v50 }
 0x3a5   : > { %v3948_v9 = vadd.f32 %v1507_v3, %v1493_v48  ;;  %2851 = vpow2.f32 %v1551_v62 }
 0x3a6   : > { %v3953_v58 = vadd.f32 %v1507_v3, %v1494_v2  ;;  %2853 = vpow2.f32 %v1553_v29 }
 0x3a7   : > { %v3957_v17 = vmul.f32 100.0, %v3948_v9 }
 0x3a8   : > { %v3960_v1 = vmul.f32 100.0, %v3953_v58  ;;  %v1456_v37 = vpop.f32.mrf.mxu2 }
 0x3a9   : > { %v1457_v56 = vadd.f32 %v1456_v37, %v1386_v15  ;;  %v1485_v63 = vpop.f32.mrf.mxu3  ;;  %v1537_v6 = vmin.f32 %v3957_v17, 20.0  ;;  %vm1545_vm11 = vcmp.gt.f32.partialorder %v3957_v17, 20.0 }
 0x3aa   : > { %v1486_v33 = vadd.f32 %v1485_v63, %v1415_v30  ;;  %v1538_v20 = vmin.f32 %v3960_v1, 20.0  ;;  %vm1546_vm0 = vcmp.gt.f32.partialorder %v3960_v1, 20.0 }
 0x3ab   : > { %v1495_v51 = vmul.f32 0.70710677, %v1457_v56  ;;  %v1555_v14 = vmul.f32 1.442695, %v1537_v6  ;;  %v3977_v7 = vpop.eup %2851 }
 0x3ac   : > { %v1496_v61 = vmul.f32 0.70710677, %v1486_v33  ;;  %v1557_v59 = vmul.f32 1.442695, %v1538_v20  ;;  %v3988_v41 = vpop.eup %2853  ;;  %v1567_v57 = vadd.f32 1.0, %v3977_v7  ;;  %v1570_v3 = vmul.f32 -0.5, %v3977_v7 }
 0x3ad   : > { %v3965_v34 = vadd.f32 %v1512_v49, %v1495_v51  ;;  %2855 = vpow2.f32 %v1555_v14  ;;  %v1576_v23 = vadd.f32 1.0, %v3988_v41  ;;  %v1579_v2 = vmul.f32 -0.5, %v3988_v41 }
 0x3ae   : > { %v3967_v28 = vadd.f32 %v1512_v49, %v1496_v61  ;;  %2857 = vpow2.f32 %v1557_v59  ;;  %v1571_v6 = vadd.f32 1.0, %v1570_v3  ;;  %v1573_v51 = vand.u32 2147483647, %v3977_v7 }
 0x3af   : > { %v3970_v45 = vmul.f32 100.0, %v3965_v34  ;;  %v1580_v29 = vadd.f32 1.0, %v1579_v2 }
 0x3b0   : > { %v3973_v18 = vmul.f32 100.0, %v3967_v28  ;;  %v1459_v60 = vpop.f32.mrf.mxu2  ;;  %vm4025_vm13 = vcmp.lt.f32.partialorder %v1573_v51, 0.0004427343 }
 0x3b1   : > { %v1539_v52 = vmin.f32 %v3970_v45, 20.0  ;;  %v1460_v16 = vadd.f32 %v1459_v60, %v1389_v42  ;;  %v1488_v0 = vpop.f32.mrf.mxu3  ;;  %v1582_v42 = vand.u32 2147483647, %v3988_v41  ;;  %vm1547_vm9 = vcmp.gt.f32.partialorder %v3970_v45, 20.0 }
 0x3b2   : > { %v1540_v25 = vmin.f32 %v3973_v18, 20.0  ;;  %v1489_v27 = vadd.f32 %v1488_v0, %v1418_v8  ;;  %vm1548_vm10 = vcmp.gt.f32.partialorder %v3973_v18, 20.0 }
 0x3b3   : > { %v1559_v31 = vmul.f32 1.442695, %v1539_v52  ;;  %v1497_v21 = vmul.f32 0.70710677, %v1460_v16  ;;  %v3994_v39 = vpop.eup %2855  ;;  %vm4031_vm14 = vcmp.lt.f32.partialorder %v1582_v42, 0.0004427343 }
 0x3b4   : > { %v1561_v47 = vmul.f32 1.442695, %v1540_v25  ;;  %v1498_v32 = vmul.f32 0.70710677, %v1489_v27  ;;  %v3997_v26 = vpop.eup %2857  ;;  %v1585_v24 = vadd.f32 1.0, %v3994_v39  ;;  %v1588_v30 = vmul.f32 -0.5, %v3994_v39 }
 0x3b5   : > { %2859 = vpow2.f32 %v1559_v31  ;;  %v3980_v19 = vadd.f32 %v3939_v53, %v1497_v21  ;;  %v1594_v48 = vadd.f32 1.0, %v3997_v26  ;;  %v1591_v38 = vand.u32 2147483647, %v3994_v39 }
 0x3b6   : > { %2861 = vpow2.f32 %v1561_v47  ;;  %v3983_v4 = vadd.f32 %v3939_v53, %v1498_v32  ;;  %v1597_v63 = vmul.f32 -0.5, %v3997_v26  ;;  %v1589_v59 = vadd.f32 1.0, %v1588_v30 }
 0x3b7   : > { %v3986_v40 = vmul.f32 100.0, %v3980_v19  ;;  %2863 = vlog2.f32 %v1567_v57  ;;  %vm4018_vm1 = vcmp.lt.f32.partialorder %v1591_v38, 0.0004427343  ;;  %v1600_v25 = vand.u32 2147483647, %v3997_v26 }
 0x3b8   : > { %v3991_v54 = vmul.f32 100.0, %v3983_v4  ;;  %v1598_v0 = vadd.f32 1.0, %v1597_v63  ;;  %v1572_v32 = vmul.f32 %v3977_v7, %v1571_v6  ;;  %v1590_v7 = vmul.f32 %v3994_v39, %v1589_v59 }
 0x3b9   : > { %v1541_v55 = vmin.f32 %v3986_v40, 20.0  ;;  %vm4047_vm6 = vcmp.lt.f32.partialorder %v1600_v25, 0.0004427343  ;;  %vm1549_vm7 = vcmp.gt.f32.partialorder %v3986_v40, 20.0 }
 0x3ba   : > { %v1542_v22 = vmin.f32 %v3991_v54, 20.0  ;;  %v1599_v30 = vmul.f32 %v3997_v26, %v1598_v0  ;;  %vm1550_vm8 = vcmp.gt.f32.partialorder %v3991_v54, 20.0 }
 0x3bb   : > { %v4000_v53 = vpop.eup %2859  ;;  %v1563_v36 = vmul.f32 1.442695, %v1541_v55 }
 0x3bc   : > { %v4003_v13 = vpop.eup %2861  ;;  %v1565_v35 = vmul.f32 1.442695, %v1542_v22  ;;  %v1603_v12 = vadd.f32 1.0, %v4000_v53  ;;  %v1606_v56 = vmul.f32 -0.5, %v4000_v53  ;;  %v1609_v31 = vand.u32 2147483647, %v4000_v53 }
 0x3bd   : > { %2865 = vpow2.f32 %v1563_v36  ;;  %v1612_v10 = vadd.f32 1.0, %v4003_v13  ;;  %v2864_v15 = vpop.eup %2863  ;;  %v1615_v62 = vmul.f32 -0.5, %v4003_v13 }
 0x3be   : > { %2867 = vpow2.f32 %v1565_v35  ;;  %v1607_v16 = vadd.f32 1.0, %v1606_v56  ;;  %v1569_v47 = vmul.f32 0.6931472, %v2864_v15  ;;  %v1581_v35 = vmul.f32 %v3988_v41, %v1580_v29 }
 0x3bf   : > { %2869 = vlog2.f32 %v1576_v23  ;;  %v1616_v21 = vadd.f32 1.0, %v1615_v62  ;;  %v1618_v23 = vand.u32 2147483647, %v4003_v13  ;;  %vm4038_vm15 = vcmp.lt.f32.partialorder %v1609_v31, 0.0004427343 }
 0x3c0   : > { %2871 = vlog2.f32 %v1603_v12  ;;  %v1608_v2 = vmul.f32 %v4000_v53, %v1607_v16  ;;  %v1575_v59 = vsel %vm4025_vm13, %v1572_v32, %v1569_v47  ;;  %v1673_v47 = vpop.permute.xlu1 %1672 }
 0x3c1   : > { %2873 = vlog2.f32 %v1612_v10  ;;  %v1617_v41 = vmul.f32 %v4003_v13, %v1616_v21  ;;  %vm1619_vm2 = vcmp.lt.f32.partialorder %v1618_v23, 0.0004427343 }
 0x3c2   : > { %2875 = vlog2.f32 %v1585_v24 }
 0x3c3   : > { %v2866_v37 = vpop.eup %2865  ;;  %2877 = vlog2.f32 %v1594_v48 }
 0x3c4   : > { %v2868_v50 = vpop.eup %2867  ;;  %v1621_v33 = vadd.f32 1.0, %v2866_v37  ;;  %v1624_v20 = vmul.f32 -0.5, %v2866_v37  ;;  %v1627_v10 = vand.u32 2147483647, %v2866_v37 }
 0x3c5   : > { %v2870_v49 = vpop.eup %2869  ;;  %v1630_v61 = vadd.f32 1.0, %v2868_v50  ;;  %v1633_v8 = vmul.f32 -0.5, %v2868_v50  ;;  %v1636_v3 = vand.u32 2147483647, %v2868_v50 }
 0x3c6   : > { %v2872_v14 = vpop.eup %2871  ;;  %2879 = vlog2.f32 %v1621_v33  ;;  %v1625_v22 = vadd.f32 1.0, %v1624_v20  ;;  %v1578_v33 = vmul.f32 0.6931472, %v2870_v49  ;;  %vm1628_vm3 = vcmp.lt.f32.partialorder %v1627_v10, 0.0004427343 }
 0x3c7   : > { %v2874_v52 = vpop.eup %2873  ;;  %2881 = vlog2.f32 %v1630_v61  ;;  %v1605_v36 = vmul.f32 0.6931472, %v2872_v14  ;;  %v1634_v24 = vadd.f32 1.0, %v1633_v8  ;;  %vm1637_vm5 = vcmp.lt.f32.partialorder %v1636_v3, 0.0004427343 }
 0x3c8   : > { %v2876_v27 = vpop.eup %2875  ;;  %v1614_v48 = vmul.f32 0.6931472, %v2874_v52  ;;  %v1626_v51 = vmul.f32 %v2866_v37, %v1625_v22  ;;  %v1584_v16 = vsel %vm4031_vm14, %v1581_v35, %v1578_v33 }
 0x3c9   : > { %v2878_v55 = vpop.eup %2877  ;;  %v1587_v15 = vmul.f32 0.6931472, %v2876_v27  ;;  %v1611_v39 = vsel %vm4038_vm15, %v1608_v2, %v1605_v36  ;;  %v1635_v20 = vmul.f32 %v2868_v50, %v1634_v24  ;;  %v1640_v27 = vmul.f32 %v1584_v16, %v3343_v43 }
 0x3ca   : > { %v1596_v63 = vmul.f32 0.6931472, %v2878_v55  ;;  %v1620_v26 = vsel %vm1619_vm2, %v1617_v41, %v1614_v48  ;;  %v1643_v42 = vmul.f32 %v1611_v39, %v3343_v43 }
 0x3cb   : > { %v1593_v29 = vsel %vm4018_vm1, %v1590_v7, %v1587_v15  ;;  %v1644_v8 = vmul.f32 %v1620_v26, %v3343_v43  ;;  %vm1544_vm1 = vcmp.gt.f32.partialorder %v3951_v44, 20.0  ;;  %v1678_v7 = vpop.permute.xlu0 %1677 }
 0x3cc   : > { %v2880_v38 = vpop.eup %2879  ;;  %v1602_v14 = vsel %vm4047_vm6, %v1599_v30, %v1596_v63  ;;  %v1641_v52 = vmul.f32 %v1593_v29, %v3343_v43  ;;  %v1651_v25 = vsel %vm1547_vm9, %v3965_v34, %v1643_v42  ;;  %v2602_v34 = vld [vmem:[%s4602_s5 + $0x80] sm:$0xff]  ;;  %v1648_v17 = vsel %vm1544_vm1, %v3943_v46, %v1640_v27  ;;  %v2605_v46 = vld [vmem:[%s4602_s5 + $0x98] sm:$0xff] }
 0x3cd   : > { %v2882_v62 = vpop.eup %2881  ;;  %v1623_v6 = vmul.f32 0.6931472, %v2880_v38  ;;  %v1642_v40 = vmul.f32 %v1602_v14, %v3343_v43  ;;  %v1652_v54 = vsel %vm1548_vm10, %v3967_v28, %v1644_v8 }
 0x3ce   : > { %v1632_v53 = vmul.f32 0.6931472, %v2882_v62 }
 0x3cf   : > { %v1629_v61 = vsel %vm1628_vm3, %v1626_v51, %v1623_v6  ;;  %v1650_v45 = vsel %vm1546_vm0, %v3953_v58, %v1642_v40 }
 0x3d0   : > { %v1645_v49 = vmul.f32 %v1629_v61, %v3343_v43  ;;  %v1638_v37 = vsel %vm1637_vm5, %v1635_v20, %v1632_v53 }
 0x3d1   : > { %v1646_v50 = vmul.f32 %v1638_v37, %v3343_v43 }
 0x3d2   : > { %v1653_v60 = vsel %vm1549_vm7, %v3980_v19, %v1645_v49  ;;  %v1639_v19 = vmul.f32 %v1575_v59, %v3343_v43 }
 0x3d3   : > { %1709 = vmatpush.msrb.mxu0 %v1653_v60  ;;  %v1654_v0 = vsel %vm1550_vm8, %v3983_v4, %v1646_v50  ;;  %v1649_v4 = vsel %vm1545_vm11, %v3948_v9, %v1641_v52  ;;  %v1683_v9 = vpop.permute.xlu2 %1682 }
 0x3d4   : > { %1738 = vmatpush.msrb.mxu1 %v1654_v0  ;;  %v1647_v28 = vsel %vm1543_vm12, %v3941_v11, %v1639_v19  ;;  %v2604_v11 = vld [vmem:[%s4602_s5 + $0x90] sm:$0xff] }
 0x3d5   : > { %1710 = vmatpush.msrb.mxu0 %v1651_v25 }
 0x3d6   : > { %1739 = vmatpush.msrb.mxu1 %v1652_v54 }
 0x3d7   : > { %1711 = vmatpush.msrb.mxu0 %v1649_v4 }
 0x3d8   : > { %1740 = vmatpush.msrb.mxu1 %v1650_v45 }
 0x3d9   : > { %1712 = vmatpush.msrb.mxu0 %v1647_v28 }
 0x3da   : > { %1741 = vmatpush.msrb.mxu1 %v1648_v17  ;;  %2610 = vmatmul.msk.f32.vlgmr.msrb.gmra.mxu0 %vm680_vm4, %v2602_v34 }
 0x3db   : > { %2614 = vmatmul.msk.f32.vlgmr.msrb.gmra.mxu1 %vm680_vm4, %v2602_v34  ;;  %v1668_v1 = vpop.permute.xlu2 %1667 }
 0x3e2   : > { %2611 = vmatmul.msk.f32.gmra.mxu0 %vm680_vm4, %v2603_v5 }
 0x3e3   : > { %2615 = vmatmul.msk.f32.gmra.mxu1 %vm680_vm4, %v2603_v5 }
 0x3ea   : > { %2612 = vmatmul.msk.f32.gmra.mxu0 %vm680_vm4, %v2604_v11 }
 0x3eb   : > { %2616 = vmatmul.msk.f32.gmra.mxu1 %vm680_vm4, %v2604_v11 }
 0x3f2   : > { %2613 = vmatmul.msk.f32.gmra.mxu0 %vm680_vm4, %v2605_v46 }
 0x3f3   : > { %2617 = vmatmul.msk.f32.gmra.mxu1 %vm680_vm4, %v2605_v46 }
 0x457   : > { %v1714_v44 = vpop.f32.mrf.mxu0 }
 0x458   : > { %v1743_v58 = vpop.f32.mrf.mxu1  ;;  %v4101_v18 = vadd.f32 %v1714_v44, %v1668_v1 }
 0x459   : > { %v4103_v31 = vadd.f32 %v1743_v58, %v1668_v1 }
 0x45a   : > { %v4106_v21 = vmul.f32 100.0, %v4101_v18 }
 0x45b   : > { %v4111_v22 = vmul.f32 100.0, %v4103_v31 }
 0x45c   : > { %v1763_v23 = vmin.f32 %v4106_v21, 20.0  ;;  %vm1771_vm1 = vcmp.gt.f32.partialorder %v4106_v21, 20.0  ;;  %v2619_v21 = vld [vmem:[%s4602_s5 + $0xa8] sm:$0xff] }
 0x45d   : > { %v1764_v10 = vmin.f32 %v4111_v22, 20.0 }
 0x45e   : > { %v1779_v24 = vmul.f32 1.442695, %v1763_v23 }
 0x45f   : > { %v1717_v32 = vpop.f32.mrf.mxu0  ;;  %v1781_v38 = vmul.f32 1.442695, %v1764_v10 }
 0x460   : > { %v4108_v57 = vadd.f32 %v1717_v32, %v1673_v47  ;;  %v1746_v55 = vpop.f32.mrf.mxu1  ;;  %2883 = vpow2.f32 %v1779_v24 }
 0x461   : > { %v4113_v36 = vadd.f32 %v1746_v55, %v1673_v47  ;;  %2885 = vpow2.f32 %v1781_v38 }
 0x462   : > { %v4117_v35 = vmul.f32 100.0, %v4108_v57 }
 0x463   : > { %v4120_v12 = vmul.f32 100.0, %v4113_v36 }
 0x464   : > { %v1765_v48 = vmin.f32 %v4117_v35, 20.0  ;;  %vm1773_vm0 = vcmp.gt.f32.partialorder %v4117_v35, 20.0 }
 0x465   : > { %v1766_v3 = vmin.f32 %v4120_v12, 20.0  ;;  %vm1774_vm12 = vcmp.gt.f32.partialorder %v4120_v12, 20.0 }
 0x466   : > { %v1783_v41 = vmul.f32 1.442695, %v1765_v48  ;;  %v4137_v26 = vpop.eup %2883 }
 0x467   : > { %v1720_v2 = vpop.f32.mrf.mxu0  ;;  %v1785_v33 = vmul.f32 1.442695, %v1766_v3  ;;  %v4146_v37 = vpop.eup %2885  ;;  %v1795_v14 = vadd.f32 1.0, %v4137_v26  ;;  %v1798_v45 = vmul.f32 -0.5, %v4137_v26  ;;  %v1801_v32 = vand.u32 2147483647, %v4137_v26 }
 0x468   : > { %v4125_v15 = vadd.f32 %v1720_v2, %v1678_v7  ;;  %v1749_v30 = vpop.f32.mrf.mxu1  ;;  %2887 = vpow2.f32 %v1783_v41  ;;  %v1804_v0 = vadd.f32 1.0, %v4146_v37  ;;  %v1807_v34 = vmul.f32 -0.5, %v4146_v37 }
 0x469   : > { %v4127_v56 = vadd.f32 %v1749_v30, %v1678_v7  ;;  %2889 = vpow2.f32 %v1785_v33  ;;  %v1799_v47 = vadd.f32 1.0, %v1798_v45  ;;  %v1810_v48 = vand.u32 2147483647, %v4146_v37 }
 0x46a   : > { %v4130_v63 = vmul.f32 100.0, %v4125_v15  ;;  %v1808_v24 = vadd.f32 1.0, %v1807_v34  ;;  %vm4183_vm14 = vcmp.lt.f32.partialorder %v1801_v32, 0.0004427343 }
 0x46b   : > { %v4133_v62 = vmul.f32 100.0, %v4127_v56  ;;  %vm4189_vm15 = vcmp.lt.f32.partialorder %v1810_v48, 0.0004427343 }
 0x46c   : > { %v1767_v6 = vmin.f32 %v4130_v63, 20.0  ;;  %vm1775_vm10 = vcmp.gt.f32.partialorder %v4130_v63, 20.0 }
 0x46d   : > { %v1768_v51 = vmin.f32 %v4133_v62, 20.0  ;;  %vm1776_vm11 = vcmp.gt.f32.partialorder %v4133_v62, 20.0 }
 0x46e   : > { %v1787_v39 = vmul.f32 1.442695, %v1767_v6  ;;  %v4152_v50 = vpop.eup %2887 }
 0x46f   : > { %v1789_v53 = vmul.f32 1.442695, %v1768_v51  ;;  %v1723_v20 = vpop.f32.mrf.mxu0  ;;  %v4155_v59 = vpop.eup %2889  ;;  %v1813_v27 = vadd.f32 1.0, %v4152_v50  ;;  %v1816_v17 = vmul.f32 -0.5, %v4152_v50  ;;  %v1819_v5 = vand.u32 2147483647, %v4152_v50 }
 0x470   : > { %2891 = vpow2.f32 %v1787_v39  ;;  %v4139_v61 = vadd.f32 %v1723_v20, %v1683_v9  ;;  %v1752_v29 = vpop.f32.mrf.mxu1  ;;  %v1822_v4 = vadd.f32 1.0, %v4155_v59  ;;  %v1828_v6 = vand.u32 2147483647, %v4155_v59 }
 0x471   : > { %2893 = vpow2.f32 %v1789_v53  ;;  %v4141_v13 = vadd.f32 %v1752_v29, %v1683_v9  ;;  %v1825_v9 = vmul.f32 -0.5, %v4155_v59  ;;  %v1817_v2 = vadd.f32 1.0, %v1816_v17 }
 0x472   : > { %v4144_v49 = vmul.f32 100.0, %v4139_v61  ;;  %2895 = vlog2.f32 %v1795_v14  ;;  %vm4176_vm13 = vcmp.lt.f32.partialorder %v1819_v5, 0.0004427343  ;;  %v1800_v29 = vmul.f32 %v4137_v26, %v1799_v47 }
 0x473   : > { %v4149_v42 = vmul.f32 100.0, %v4141_v13  ;;  %v1826_v33 = vadd.f32 1.0, %v1825_v9  ;;  %v1818_v26 = vmul.f32 %v4152_v50, %v1817_v2  ;;  %vm4205_vm7 = vcmp.lt.f32.partialorder %v1828_v6, 0.0004427343 }
 0x474   : > { %v1769_v8 = vmin.f32 %v4144_v49, 20.0  ;;  %vm1777_vm8 = vcmp.gt.f32.partialorder %v4144_v49, 20.0 }
 0x475   : > { %v1770_v60 = vmin.f32 %v4149_v42, 20.0  ;;  %v1827_v17 = vmul.f32 %v4155_v59, %v1826_v33  ;;  %vm1778_vm9 = vcmp.gt.f32.partialorder %v4149_v42, 20.0 }
 0x476   : > { %v4158_v52 = vpop.eup %2891  ;;  %v1791_v16 = vmul.f32 1.442695, %v1769_v8 }
 0x477   : > { %v4161_v40 = vpop.eup %2893  ;;  %v1793_v25 = vmul.f32 1.442695, %v1770_v60  ;;  %v1831_v19 = vadd.f32 1.0, %v4158_v52  ;;  %v1834_v46 = vmul.f32 -0.5, %v4158_v52  ;;  %v1837_v39 = vand.u32 2147483647, %v4158_v52 }
 0x478   : > { %2897 = vpow2.f32 %v1791_v16  ;;  %v1840_v54 = vadd.f32 1.0, %v4161_v40  ;;  %v2896_v28 = vpop.eup %2895  ;;  %v1843_v1 = vmul.f32 -0.5, %v4161_v40 }
 0x479   : > { %2899 = vpow2.f32 %v1793_v25  ;;  %v1835_v41 = vadd.f32 1.0, %v1834_v46  ;;  %v1797_v20 = vmul.f32 0.6931472, %v2896_v28  ;;  %v1809_v25 = vmul.f32 %v4146_v37, %v1808_v24 }
 0x47a   : > { %2901 = vlog2.f32 %v1804_v0  ;;  %v1844_v53 = vadd.f32 1.0, %v1843_v1  ;;  %v1846_v0 = vand.u32 2147483647, %v4161_v40  ;;  %vm4196_vm2 = vcmp.lt.f32.partialorder %v1837_v39, 0.0004427343 }
 0x47b   : > { %2903 = vlog2.f32 %v1831_v19  ;;  %v1836_v34 = vmul.f32 %v4158_v52, %v1835_v41  ;;  %v1803_v2 = vsel %vm4183_vm14, %v1800_v29, %v1797_v20  ;;  %v1901_v20 = vpop.permute.xlu2 %1900 }
 0x47c   : > { %2905 = vlog2.f32 %v1840_v54  ;;  %v1845_v37 = vmul.f32 %v4161_v40, %v1844_v53  ;;  %vm1847_vm3 = vcmp.lt.f32.partialorder %v1846_v0, 0.0004427343  ;;  %v1867_v42 = vmul.f32 %v1803_v2, %v3343_v43 }
 0x47d   : > { %2907 = vlog2.f32 %v1813_v27 }
 0x47e   : > { %v2898_v11 = vpop.eup %2897  ;;  %2909 = vlog2.f32 %v1822_v4 }
 0x47f   : > { %v2900_v44 = vpop.eup %2899  ;;  %v1849_v58 = vadd.f32 1.0, %v2898_v11  ;;  %v1852_v23 = vmul.f32 -0.5, %v2898_v11  ;;  %v1855_v54 = vand.u32 2147483647, %v2898_v11 }
 0x480   : > { %v2902_v55 = vpop.eup %2901  ;;  %v1858_v10 = vadd.f32 1.0, %v2900_v44  ;;  %v1861_v3 = vmul.f32 -0.5, %v2900_v44  ;;  %v1864_v45 = vand.u32 2147483647, %v2900_v44 }
 0x481   : > { %v2904_v7 = vpop.eup %2903  ;;  %2911 = vlog2.f32 %v1849_v58  ;;  %v1853_v60 = vadd.f32 1.0, %v1852_v23  ;;  %v1806_v58 = vmul.f32 0.6931472, %v2902_v55  ;;  %vm1856_vm5 = vcmp.lt.f32.partialorder %v1855_v54, 0.0004427343 }
 0x482   : > { %v2906_v38 = vpop.eup %2905  ;;  %2913 = vlog2.f32 %v1858_v10  ;;  %v1833_v16 = vmul.f32 0.6931472, %v2904_v7  ;;  %v1862_v27 = vadd.f32 1.0, %v1861_v3  ;;  %vm1865_vm6 = vcmp.lt.f32.partialorder %v1864_v45, 0.0004427343 }
 0x483   : > { %v2908_v51 = vpop.eup %2907  ;;  %v1842_v4 = vmul.f32 0.6931472, %v2906_v38  ;;  %v1854_v32 = vmul.f32 %v2898_v11, %v1853_v60  ;;  %v1812_v41 = vsel %vm4189_vm15, %v1809_v25, %v1806_v58 }
 0x484   : > { %v2910_v8 = vpop.eup %2909  ;;  %v1815_v28 = vmul.f32 0.6931472, %v2908_v51  ;;  %v1839_v50 = vsel %vm4196_vm2, %v1836_v34, %v1833_v16  ;;  %v1863_v23 = vmul.f32 %v2900_v44, %v1862_v27  ;;  %v1868_v51 = vmul.f32 %v1812_v41, %v3343_v43 }
 0x485   : > { %v1824_v9 = vmul.f32 0.6931472, %v2910_v8  ;;  %v1848_v59 = vsel %vm1847_vm3, %v1845_v37, %v1842_v4  ;;  %v1871_v48 = vmul.f32 %v1839_v50, %v3343_v43 }
 0x486   : > { %v1821_v24 = vsel %vm4176_vm13, %v1818_v26, %v1815_v28  ;;  %v1872_v3 = vmul.f32 %v1848_v59, %v3343_v43  ;;  %vm1772_vm13 = vcmp.gt.f32.partialorder %v4111_v22, 20.0  ;;  %v1906_v26 = vpop.permute.xlu1 %1905 }
 0x487   : > { %v2912_v5 = vpop.eup %2911  ;;  %v1830_v7 = vsel %vm4205_vm7, %v1827_v17, %v1824_v9  ;;  %v1869_v38 = vmul.f32 %v1821_v24, %v3343_v43  ;;  %v1879_v6 = vsel %vm1775_vm10, %v4125_v15, %v1871_v48  ;;  %v2618_v15 = vld [vmem:[%s4602_s5 + $0xa0] sm:$0xff]  ;;  %v1876_v35 = vsel %vm1772_vm13, %v4103_v31, %v1868_v51  ;;  %v2621_v31 = vld [vmem:[%s4602_s5 + $0xb8] sm:$0xff] }
 0x488   : > { %v2914_v1 = vpop.eup %2913  ;;  %v1851_v47 = vmul.f32 0.6931472, %v2912_v5  ;;  %v1870_v49 = vmul.f32 %v1830_v7, %v3343_v43 }
 0x489   : > { %v1860_v52 = vmul.f32 0.6931472, %v2914_v1 }
 0x48a   : > { %v1857_v10 = vsel %vm1856_vm5, %v1854_v32, %v1851_v47  ;;  %v1878_v63 = vsel %vm1774_vm12, %v4113_v36, %v1870_v49 }
 0x48b   : > { %v1873_v55 = vmul.f32 %v1857_v10, %v3343_v43  ;;  %v1866_v11 = vsel %vm1865_vm6, %v1863_v23, %v1860_v52 }
 0x48c   : > { %v1874_v44 = vmul.f32 %v1866_v11, %v3343_v43 }
 0x48d   : > { %v1881_v30 = vsel %vm1777_vm8, %v4139_v61, %v1873_v55  ;;  %v1880_v61 = vsel %vm1776_vm11, %v4127_v56, %v1872_v3  ;;  %v1875_v56 = vsel %vm1771_vm1, %v4101_v18, %v1867_v42  ;;  %v2620_v18 = vld [vmem:[%s4602_s5 + $0xb0] sm:$0xff] }
 0x48e   : > { %1937 = vmatpush.msra.mxu2 %v1881_v30  ;;  %v1882_v33 = vsel %vm1778_vm9, %v4141_v13, %v1874_v44  ;;  %v1877_v13 = vsel %vm1773_vm0, %v4108_v57, %v1869_v38  ;;  %v1911_v57 = vpop.permute.xlu0 %1910 }
 0x48f   : > { %1966 = vmatpush.msra.mxu3 %v1882_v33 }
 0x490   : > { %1938 = vmatpush.msra.mxu2 %v1879_v6 }
 0x491   : > { %1967 = vmatpush.msra.mxu3 %v1880_v61 }
 0x492   : > { %1939 = vmatpush.msra.mxu2 %v1877_v13 }
 0x493   : > { %1968 = vmatpush.msra.mxu3 %v1878_v63 }
 0x494   : > { %1940 = vmatpush.msra.mxu2 %v1875_v56 }
 0x495   : > { %1969 = vmatpush.msra.mxu3 %v1876_v35  ;;  %2626 = vmatmul.msk.f32.vlgmr.msra.gmra.mxu2 %vm680_vm4, %v2618_v15 }
 0x496   : > { %2630 = vmatmul.msk.f32.vlgmr.msra.gmra.mxu3 %vm680_vm4, %v2618_v15  ;;  %v1896_v12 = vpop.permute.xlu0 %1895 }
 0x49d   : > { %2627 = vmatmul.msk.f32.gmra.mxu2 %vm680_vm4, %v2619_v21 }
 0x49e   : > { %2631 = vmatmul.msk.f32.gmra.mxu3 %vm680_vm4, %v2619_v21 }
 0x4a5   : > { %2628 = vmatmul.msk.f32.gmra.mxu2 %vm680_vm4, %v2620_v18 }
 0x4a6   : > { %2632 = vmatmul.msk.f32.gmra.mxu3 %vm680_vm4, %v2620_v18 }
 0x4ad   : > { %2629 = vmatmul.msk.f32.gmra.mxu2 %vm680_vm4, %v2621_v31 }
 0x4ae   : > { %2633 = vmatmul.msk.f32.gmra.mxu3 %vm680_vm4, %v2621_v31 }
 0x518   : > { %v1942_v22 = vpop.f32.mrf.mxu2 }
 0x519   : > { %v1971_v36 = vpop.f32.mrf.mxu3  ;;  %v4259_v62 = vadd.f32 %v1942_v22, %v1896_v12 }
 0x51a   : > { %v4261_v39 = vadd.f32 %v1971_v36, %v1896_v12 }
 0x51b   : > { %v4264_v53 = vmul.f32 100.0, %v4259_v62 }
 0x51c   : > { %v4269_v60 = vmul.f32 100.0, %v4261_v39 }
 0x51d   : > { %v1991_v0 = vmin.f32 %v4264_v53, 20.0  ;;  %vm1999_vm13 = vcmp.gt.f32.partialorder %v4264_v53, 20.0  ;;  %v2635_v53 = vld [vmem:[%s4602_s5 + $0xc8] sm:$0xff] }
 0x51e   : > { %v1992_v54 = vmin.f32 %v4269_v60, 20.0 }
 0x51f   : > { %v2007_v27 = vmul.f32 1.442695, %v1991_v0 }
 0x520   : > { %v1945_v29 = vpop.f32.mrf.mxu2  ;;  %v2009_v5 = vmul.f32 1.442695, %v1992_v54 }
 0x521   : > { %v4266_v14 = vadd.f32 %v1945_v29, %v1901_v20  ;;  %v1974_v8 = vpop.f32.mrf.mxu3  ;;  %2915 = vpow2.f32 %v2007_v27 }
 0x522   : > { %v4271_v16 = vadd.f32 %v1974_v8, %v1901_v20  ;;  %2917 = vpow2.f32 %v2009_v5 }
 0x523   : > { %v4275_v25 = vmul.f32 100.0, %v4266_v14 }
 0x524   : > { %v4278_v19 = vmul.f32 100.0, %v4271_v16 }
 0x525   : > { %v1993_v4 = vmin.f32 %v4275_v25, 20.0  ;;  %vm2001_vm12 = vcmp.gt.f32.partialorder %v4275_v25, 20.0 }
 0x526   : > { %v1994_v45 = vmin.f32 %v4278_v19, 20.0  ;;  %vm2002_vm1 = vcmp.gt.f32.partialorder %v4278_v19, 20.0 }
 0x527   : > { %v2011_v37 = vmul.f32 1.442695, %v1993_v4  ;;  %v4295_v59 = vpop.eup %2915 }
 0x528   : > { %v1948_v34 = vpop.f32.mrf.mxu2  ;;  %v2013_v58 = vmul.f32 1.442695, %v1994_v45  ;;  %v4304_v11 = vpop.eup %2917  ;;  %v2023_v7 = vadd.f32 1.0, %v4295_v59  ;;  %v2026_v63 = vmul.f32 -0.5, %v4295_v59  ;;  %v2029_v29 = vand.u32 2147483647, %v4295_v59 }
 0x529   : > { %v4283_v28 = vadd.f32 %v1948_v34, %v1906_v26  ;;  %v1977_v17 = vpop.f32.mrf.mxu3  ;;  %2919 = vpow2.f32 %v2011_v37  ;;  %v2032_v33 = vadd.f32 1.0, %v4304_v11  ;;  %v2035_v15 = vmul.f32 -0.5, %v4304_v11 }
 0x52a   : > { %v4285_v46 = vadd.f32 %v1977_v17, %v1906_v26  ;;  %2921 = vpow2.f32 %v2013_v58  ;;  %v2027_v20 = vadd.f32 1.0, %v2026_v63  ;;  %v2038_v4 = vand.u32 2147483647, %v4304_v11 }
 0x52b   : > { %v4288_v9 = vmul.f32 100.0, %v4283_v28  ;;  %v2036_v27 = vadd.f32 1.0, %v2035_v15  ;;  %vm4341_vm15 = vcmp.lt.f32.partialorder %v2029_v29, 0.0004427343 }
 0x52c   : > { %v4291_v1 = vmul.f32 100.0, %v4285_v46  ;;  %vm4347_vm2 = vcmp.lt.f32.partialorder %v2038_v4, 0.0004427343 }
 0x52d   : > { %v1995_v47 = vmin.f32 %v4288_v9, 20.0  ;;  %vm2003_vm11 = vcmp.gt.f32.partialorder %v4288_v9, 20.0 }
 0x52e   : > { %v1996_v32 = vmin.f32 %v4291_v1, 20.0  ;;  %vm2004_vm0 = vcmp.gt.f32.partialorder %v4291_v1, 20.0 }
 0x52f   : > { %v2015_v50 = vmul.f32 1.442695, %v1995_v47  ;;  %v4310_v44 = vpop.eup %2919 }
 0x530   : > { %v2017_v52 = vmul.f32 1.442695, %v1996_v32  ;;  %v1951_v23 = vpop.f32.mrf.mxu2  ;;  %v4313_v2 = vpop.eup %2921  ;;  %v2041_v51 = vadd.f32 1.0, %v4310_v44  ;;  %v2044_v35 = vmul.f32 -0.5, %v4310_v44  ;;  %v2047_v21 = vand.u32 2147483647, %v4310_v44 }
 0x531   : > { %2923 = vpow2.f32 %v2015_v50  ;;  %v4297_v10 = vadd.f32 %v1951_v23, %v1911_v57  ;;  %v1980_v24 = vpop.f32.mrf.mxu3  ;;  %v2050_v13 = vadd.f32 1.0, %v4313_v2  ;;  %v2056_v47 = vand.u32 2147483647, %v4313_v2 }
 0x532   : > { %2925 = vpow2.f32 %v2017_v52  ;;  %v4299_v40 = vadd.f32 %v1980_v24, %v1911_v57  ;;  %v2053_v57 = vmul.f32 -0.5, %v4313_v2  ;;  %v2045_v34 = vadd.f32 1.0, %v2044_v35 }
 0x533   : > { %v4302_v55 = vmul.f32 100.0, %v4297_v10  ;;  %2927 = vlog2.f32 %v2023_v7  ;;  %vm4334_vm14 = vcmp.lt.f32.partialorder %v2047_v21, 0.0004427343  ;;  %v2028_v24 = vmul.f32 %v4295_v59, %v2027_v20 }
 0x534   : > { %v4307_v48 = vmul.f32 100.0, %v4299_v40  ;;  %v2054_v58 = vadd.f32 1.0, %v2053_v57  ;;  %v2046_v59 = vmul.f32 %v4310_v44, %v2045_v34  ;;  %vm4363_vm8 = vcmp.lt.f32.partialorder %v2056_v47, 0.0004427343 }
 0x535   : > { %v1997_v3 = vmin.f32 %v4302_v55, 20.0  ;;  %vm2005_vm9 = vcmp.gt.f32.partialorder %v4302_v55, 20.0 }
 0x536   : > { %v1998_v30 = vmin.f32 %v4307_v48, 20.0  ;;  %v2055_v35 = vmul.f32 %v4313_v2, %v2054_v58  ;;  %vm2006_vm10 = vcmp.gt.f32.partialorder %v4307_v48, 20.0 }
 0x537   : > { %v4316_v38 = vpop.eup %2923  ;;  %v2019_v41 = vmul.f32 1.442695, %v1997_v3 }
 0x538   : > { %v4319_v49 = vpop.eup %2925  ;;  %v2021_v6 = vmul.f32 1.442695, %v1998_v30  ;;  %v2059_v42 = vadd.f32 1.0, %v4316_v38  ;;  %v2062_v31 = vmul.f32 -0.5, %v4316_v38  ;;  %v2065_v50 = vand.u32 2147483647, %v4316_v38 }
 0x539   : > { %2929 = vpow2.f32 %v2019_v41  ;;  %v2068_v61 = vadd.f32 1.0, %v4319_v49  ;;  %v2928_v56 = vpop.eup %2927  ;;  %v2071_v12 = vmul.f32 -0.5, %v4319_v49 }
 0x53a   : > { %2931 = vpow2.f32 %v2021_v6  ;;  %v2063_v37 = vadd.f32 1.0, %v2062_v31  ;;  %v2025_v23 = vmul.f32 0.6931472, %v2928_v56  ;;  %v2037_v6 = vmul.f32 %v4304_v11, %v2036_v27 }
 0x53b   : > { %2933 = vlog2.f32 %v2032_v33  ;;  %v2072_v52 = vadd.f32 1.0, %v2071_v12  ;;  %v2074_v33 = vand.u32 2147483647, %v4319_v49  ;;  %vm4354_vm3 = vcmp.lt.f32.partialorder %v2065_v50, 0.0004427343 }
 0x53c   : > { %2935 = vlog2.f32 %v2059_v42  ;;  %v2064_v15 = vmul.f32 %v4316_v38, %v2063_v37  ;;  %v2031_v34 = vsel %vm4341_vm15, %v2028_v24, %v2025_v23  ;;  %v2129_v23 = vpop.permute.xlu0 %2128 }
 0x53d   : > { %2937 = vlog2.f32 %v2068_v61  ;;  %v2073_v11 = vmul.f32 %v4319_v49, %v2072_v52  ;;  %vm2075_vm5 = vcmp.lt.f32.partialorder %v2074_v33, 0.0004427343  ;;  %v2095_v48 = vmul.f32 %v2031_v34, %v3343_v43 }
 0x53e   : > { %2939 = vlog2.f32 %v2041_v51 }
 0x53f   : > { %v2930_v18 = vpop.eup %2929  ;;  %2941 = vlog2.f32 %v2050_v13 }
 0x540   : > { %v2932_v22 = vpop.eup %2931  ;;  %v2077_v36 = vadd.f32 1.0, %v2930_v18  ;;  %v2080_v0 = vmul.f32 -0.5, %v2930_v18  ;;  %v2083_v61 = vand.u32 2147483647, %v2930_v18 }
 0x541   : > { %v2934_v8 = vpop.eup %2933  ;;  %v2086_v54 = vadd.f32 1.0, %v2932_v22  ;;  %v2089_v45 = vmul.f32 -0.5, %v2932_v22  ;;  %v2092_v63 = vand.u32 2147483647, %v2932_v22 }
 0x542   : > { %v2936_v26 = vpop.eup %2935  ;;  %2943 = vlog2.f32 %v2077_v36  ;;  %v2081_v30 = vadd.f32 1.0, %v2080_v0  ;;  %v2034_v36 = vmul.f32 0.6931472, %v2934_v8  ;;  %vm2084_vm6 = vcmp.lt.f32.partialorder %v2083_v61, 0.0004427343 }
 0x543   : > { %v2938_v5 = vpop.eup %2937  ;;  %2945 = vlog2.f32 %v2086_v54  ;;  %v2061_v41 = vmul.f32 0.6931472, %v2936_v26  ;;  %v2090_v51 = vadd.f32 1.0, %v2089_v45  ;;  %vm2093_vm7 = vcmp.lt.f32.partialorder %v2092_v63, 0.0004427343 }
 0x544   : > { %v2940_v32 = vpop.eup %2939  ;;  %v2070_v13 = vmul.f32 0.6931472, %v2938_v5  ;;  %v2082_v29 = vmul.f32 %v2930_v18, %v2081_v30  ;;  %v2040_v37 = vsel %vm4347_vm2, %v2037_v6, %v2034_v36 }
 0x545   : > { %v2942_v3 = vpop.eup %2941  ;;  %v2043_v56 = vmul.f32 0.6931472, %v2940_v32  ;;  %v2067_v44 = vsel %vm4354_vm3, %v2064_v15, %v2061_v41  ;;  %v2091_v0 = vmul.f32 %v2932_v22, %v2090_v51  ;;  %v2096_v32 = vmul.f32 %v2040_v37, %v3343_v43 }
 0x546   : > { %v2052_v57 = vmul.f32 0.6931472, %v2942_v3  ;;  %v2076_v2 = vsel %vm2075_vm5, %v2073_v11, %v2070_v13  ;;  %v2099_v4 = vmul.f32 %v2067_v44, %v3343_v43 }
 0x547   : > { %v2049_v27 = vsel %vm4334_vm14, %v2046_v59, %v2043_v56  ;;  %v2100_v45 = vmul.f32 %v2076_v2, %v3343_v43  ;;  %vm2000_vm14 = vcmp.gt.f32.partialorder %v4269_v60, 20.0  ;;  %v2134_v59 = vpop.permute.xlu2 %2133 }
 0x548   : > { %v2944_v21 = vpop.eup %2943  ;;  %v2058_v26 = vsel %vm4363_vm8, %v2055_v35, %v2052_v57  ;;  %v2097_v5 = vmul.f32 %v2049_v27, %v3343_v43  ;;  %v2107_v47 = vsel %vm2003_vm11, %v4283_v28, %v2099_v4  ;;  %v2634_v28 = vld [vmem:[%s4602_s5 + $0xc0] sm:$0xff]  ;;  %v2104_v25 = vsel %vm2000_vm14, %v4261_v39, %v2096_v32  ;;  %v2637_v39 = vld [vmem:[%s4602_s5 + $0xd8] sm:$0xff] }
 0x549   : > { %v2946_v12 = vpop.eup %2945  ;;  %v2079_v20 = vmul.f32 0.6931472, %v2944_v21  ;;  %v2098_v55 = vmul.f32 %v2058_v26, %v3343_v43 }
 0x54a   : > { %v2088_v38 = vmul.f32 0.6931472, %v2946_v12 }
 0x54b   : > { %v2085_v54 = vsel %vm2084_vm6, %v2082_v29, %v2079_v20  ;;  %v2106_v9 = vsel %vm2002_vm1, %v4271_v16, %v2098_v55 }
 0x54c   : > { %v2101_v8 = vmul.f32 %v2085_v54, %v3343_v43  ;;  %v2094_v18 = vsel %vm2093_vm7, %v2091_v0, %v2088_v38 }
 0x54d   : > { %v2102_v22 = vmul.f32 %v2094_v18, %v3343_v43 }
 0x54e   : > { %v2109_v17 = vsel %vm2005_vm9, %v4297_v10, %v2101_v8  ;;  %v2108_v10 = vsel %vm2004_vm0, %v4285_v46, %v2100_v45  ;;  %v2103_v46 = vsel %vm1999_vm13, %v4259_v62, %v2095_v48  ;;  %v2636_v62 = vld [vmem:[%s4602_s5 + $0xd0] sm:$0xff] }
 0x54f   : > { %2165 = vmatpush.msra.mxu0 %v2109_v17  ;;  %v2110_v58 = vsel %vm2006_vm10, %v4299_v40, %v2102_v22  ;;  %v2105_v40 = vsel %vm2001_vm12, %v4266_v14, %v2097_v5  ;;  %v2139_v14 = vpop.permute.xlu1 %2138 }
 0x550   : > { %2194 = vmatpush.msra.mxu1 %v2110_v58 }
 0x551   : > { %2166 = vmatpush.msra.mxu0 %v2107_v47 }
 0x552   : > { %2195 = vmatpush.msra.mxu1 %v2108_v10 }
 0x553   : > { %2167 = vmatpush.msra.mxu0 %v2105_v40 }
 0x554   : > { %2196 = vmatpush.msra.mxu1 %v2106_v9 }
 0x555   : > { %2168 = vmatpush.msra.mxu0 %v2103_v46 }
 0x556   : > { %2197 = vmatpush.msra.mxu1 %v2104_v25  ;;  %2642 = vmatmul.msk.f32.vlgmr.msra.gmra.mxu0 %vm680_vm4, %v2634_v28 }
 0x557   : > { %2646 = vmatmul.msk.f32.vlgmr.msra.gmra.mxu1 %vm680_vm4, %v2634_v28  ;;  %v2124_v19 = vpop.permute.xlu1 %2123 }
 0x55e   : > { %2643 = vmatmul.msk.f32.gmra.mxu0 %vm680_vm4, %v2635_v53 }
 0x55f   : > { %2647 = vmatmul.msk.f32.gmra.mxu1 %vm680_vm4, %v2635_v53 }
 0x566   : > { %2644 = vmatmul.msk.f32.gmra.mxu0 %vm680_vm4, %v2636_v62 }
 0x567   : > { %2648 = vmatmul.msk.f32.gmra.mxu1 %vm680_vm4, %v2636_v62 }
 0x56e   : > { %2645 = vmatmul.msk.f32.gmra.mxu0 %vm680_vm4, %v2637_v39 }
 0x56f   : > { %2649 = vmatmul.msk.f32.gmra.mxu1 %vm680_vm4, %v2637_v39 }
 0x5d3   : > { %v2170_v60 = vpop.f32.mrf.mxu0 }
 0x5d4   : > { %v2199_v16 = vpop.f32.mrf.mxu1  ;;  %v4417_v1 = vadd.f32 %v2170_v60, %v2124_v19 }
 0x5d5   : > { %v4419_v50 = vadd.f32 %v2199_v16, %v2124_v19 }
 0x5d6   : > { %v4422_v52 = vmul.f32 100.0, %v4417_v1 }
 0x5d7   : > { %v4427_v30 = vmul.f32 100.0, %v4419_v50 }
 0x5d8   : > { %v2219_v33 = vmin.f32 %v4422_v52, 20.0  ;;  %vm2227_vm14 = vcmp.gt.f32.partialorder %v4422_v52, 20.0  ;;  %v2344_v52 = vpop.permute.xlu2 %2343 }
 0x5d9   : > { %v2220_v61 = vmin.f32 %v4427_v30, 20.0 }
 0x5da   : > { %v2235_v51 = vmul.f32 1.442695, %v2219_v33 }
 0x5db   : > { %v2173_v24 = vpop.f32.mrf.mxu0  ;;  %v2237_v21 = vmul.f32 1.442695, %v2220_v61 }
 0x5dc   : > { %v4424_v7 = vadd.f32 %v2173_v24, %v2129_v23  ;;  %v2202_v3 = vpop.f32.mrf.mxu1  ;;  %2947 = vpow2.f32 %v2235_v51 }
 0x5dd   : > { %v4429_v41 = vadd.f32 %v2202_v3, %v2129_v23  ;;  %2949 = vpow2.f32 %v2237_v21 }
 0x5de   : > { %v4433_v6 = vmul.f32 100.0, %v4424_v7 }
 0x5df   : > { %v4436_v42 = vmul.f32 100.0, %v4429_v41 }
 0x5e0   : > { %v2221_v13 = vmin.f32 %v4433_v6, 20.0  ;;  %vm2229_vm1 = vcmp.gt.f32.partialorder %v4433_v6, 20.0 }
 0x5e1   : > { %v2222_v63 = vmin.f32 %v4436_v42, 20.0  ;;  %vm2230_vm13 = vcmp.gt.f32.partialorder %v4436_v42, 20.0 }
 0x5e2   : > { %v2239_v11 = vmul.f32 1.442695, %v2221_v13  ;;  %v4453_v2 = vpop.eup %2947 }
 0x5e3   : > { %v2176_v15 = vpop.f32.mrf.mxu0  ;;  %v2241_v36 = vmul.f32 1.442695, %v2222_v63  ;;  %v4462_v18 = vpop.eup %2949  ;;  %v2251_v26 = vadd.f32 1.0, %v4453_v2  ;;  %v2254_v9 = vmul.f32 -0.5, %v4453_v2  ;;  %v2257_v24 = vand.u32 2147483647, %v4453_v2 }
 0x5e4   : > { %v4441_v56 = vadd.f32 %v2176_v15, %v2134_v59  ;;  %v2205_v35 = vpop.f32.mrf.mxu1  ;;  %2951 = vpow2.f32 %v2239_v11  ;;  %v2260_v58 = vadd.f32 1.0, %v4462_v18  ;;  %v2263_v28 = vmul.f32 -0.5, %v4462_v18 }
 0x5e5   : > { %v4443_v31 = vadd.f32 %v2205_v35, %v2134_v59  ;;  %2953 = vpow2.f32 %v2241_v36  ;;  %v2255_v23 = vadd.f32 1.0, %v2254_v9  ;;  %v2266_v13 = vand.u32 2147483647, %v4462_v18 }
 0x5e6   : > { %v4446_v57 = vmul.f32 100.0, %v4441_v56  ;;  %v2264_v51 = vadd.f32 1.0, %v2263_v28  ;;  %vm4499_vm2 = vcmp.lt.f32.partialorder %v2257_v24, 0.0004427343 }
 0x5e7   : > { %v4449_v12 = vmul.f32 100.0, %v4443_v31  ;;  %vm4505_vm3 = vcmp.lt.f32.partialorder %v2266_v13, 0.0004427343 }
 0x5e8   : > { %v2223_v20 = vmin.f32 %v4446_v57, 20.0  ;;  %vm2231_vm0 = vcmp.gt.f32.partialorder %v4446_v57, 20.0 }
 0x5e9   : > { %v2224_v29 = vmin.f32 %v4449_v12, 20.0  ;;  %vm2232_vm12 = vcmp.gt.f32.partialorder %v4449_v12, 20.0 }
 0x5ea   : > { %v2243_v44 = vmul.f32 1.442695, %v2223_v20  ;;  %v4468_v22 = vpop.eup %2951 }
 0x5eb   : > { %v2245_v38 = vmul.f32 1.442695, %v2224_v29  ;;  %v2179_v0 = vpop.f32.mrf.mxu0  ;;  %v4471_v34 = vpop.eup %2953  ;;  %v2269_v32 = vadd.f32 1.0, %v4468_v22  ;;  %v2272_v25 = vmul.f32 -0.5, %v4468_v22  ;;  %v2275_v53 = vand.u32 2147483647, %v4468_v22 }
 0x5ec   : > { %2955 = vpow2.f32 %v2243_v44  ;;  %v4455_v54 = vadd.f32 %v2179_v0, %v2139_v14  ;;  %v2208_v27 = vpop.f32.mrf.mxu1  ;;  %v2278_v40 = vadd.f32 1.0, %v4471_v34  ;;  %v2284_v20 = vand.u32 2147483647, %v4471_v34 }
 0x5ed   : > { %2957 = vpow2.f32 %v2245_v38  ;;  %v4457_v49 = vadd.f32 %v2208_v27, %v2139_v14  ;;  %v2281_v14 = vmul.f32 -0.5, %v4471_v34  ;;  %v2273_v15 = vadd.f32 1.0, %v2272_v25 }
 0x5ee   : > { %v4460_v8 = vmul.f32 100.0, %v4455_v54  ;;  %2959 = vlog2.f32 %v2251_v26  ;;  %vm4492_vm15 = vcmp.lt.f32.partialorder %v2275_v53, 0.0004427343  ;;  %v2256_v27 = vmul.f32 %v4453_v2, %v2255_v23 }
 0x5ef   : > { %v4465_v4 = vmul.f32 100.0, %v4457_v49  ;;  %v2282_v36 = vadd.f32 1.0, %v2281_v14  ;;  %v2274_v2 = vmul.f32 %v4468_v22, %v2273_v15  ;;  %vm4521_vm9 = vcmp.lt.f32.partialorder %v2284_v20, 0.0004427343 }
 0x5f0   : > { %v2225_v45 = vmin.f32 %v4460_v8, 20.0  ;;  %vm2233_vm10 = vcmp.gt.f32.partialorder %v4460_v8, 20.0 }
 0x5f1   : > { %v2226_v17 = vmin.f32 %v4465_v4, 20.0  ;;  %v2283_v25 = vmul.f32 %v4471_v34, %v2282_v36  ;;  %vm2234_vm11 = vcmp.gt.f32.partialorder %v4465_v4, 20.0 }
 0x5f2   : > { %v4474_v5 = vpop.eup %2955  ;;  %v2247_v37 = vmul.f32 1.442695, %v2225_v45 }
 0x5f3   : > { %v4477_v55 = vpop.eup %2957  ;;  %v2249_v47 = vmul.f32 1.442695, %v2226_v17  ;;  %v2287_v48 = vadd.f32 1.0, %v4474_v5  ;;  %v2290_v39 = vmul.f32 -0.5, %v4474_v5  ;;  %v2293_v44 = vand.u32 2147483647, %v4474_v5 }
 0x5f4   : > { %2961 = vpow2.f32 %v2247_v37  ;;  %v2296_v10 = vadd.f32 1.0, %v4477_v55  ;;  %v2960_v46 = vpop.eup %2959  ;;  %v2299_v19 = vmul.f32 -0.5, %v4477_v55 }
 0x5f5   : > { %2963 = vpow2.f32 %v2249_v47  ;;  %v2291_v11 = vadd.f32 1.0, %v2290_v39  ;;  %v2253_v0 = vmul.f32 0.6931472, %v2960_v46  ;;  %v2265_v47 = vmul.f32 %v4462_v18, %v2264_v51 }
 0x5f6   : > { %2965 = vlog2.f32 %v2260_v58  ;;  %v2300_v38 = vadd.f32 1.0, %v2299_v19  ;;  %v2302_v58 = vand.u32 2147483647, %v4477_v55  ;;  %vm4512_vm5 = vcmp.lt.f32.partialorder %v2293_v44, 0.0004427343 }
 0x5f7   : > { %2967 = vlog2.f32 %v2287_v48  ;;  %v2292_v28 = vmul.f32 %v4474_v5, %v2291_v11  ;;  %v2259_v15 = vsel %vm4499_vm2, %v2256_v27, %v2253_v0  ;;  %vm2393_vm2 = vcmask 1040384  }
 0x5f8   : > { %2969 = vlog2.f32 %v2296_v10  ;;  %v2301_v18 = vmul.f32 %v4477_v55, %v2300_v38  ;;  %vm2303_vm6 = vcmp.lt.f32.partialorder %v2302_v58, 0.0004427343  ;;  %v2323_v4 = vmul.f32 %v2259_v15, %v3343_v43 }
 0x5f9   : > { %2971 = vlog2.f32 %v2269_v32 }
 0x5fa   : > { %v2962_v62 = vpop.eup %2961  ;;  %2973 = vlog2.f32 %v2278_v40  ;;  %v2331_v6 = vsel %vm2227_vm14, %v4417_v1, %v2323_v4  ;;  %v2396_v1 = vlaneseq }
 0x5fb   : > { %v2964_v60 = vpop.eup %2963  ;;  %v2305_v16 = vadd.f32 1.0, %v2962_v62  ;;  %v2308_v33 = vmul.f32 -0.5, %v2962_v62  ;;  %v2311_v10 = vand.u32 2147483647, %v2962_v62 }
 0x5fc   : > { %v2966_v3 = vpop.eup %2965  ;;  %v2314_v61 = vadd.f32 1.0, %v2964_v60  ;;  %v2317_v63 = vmul.f32 -0.5, %v2964_v60  ;;  %v2320_v9 = vand.u32 2147483647, %v2964_v60 }
 0x5fd   : > { %v2968_v59 = vpop.eup %2967  ;;  %2975 = vlog2.f32 %v2305_v16  ;;  %v2309_v17 = vadd.f32 1.0, %v2308_v33  ;;  %v2262_v16 = vmul.f32 0.6931472, %v2966_v3  ;;  %vm2312_vm7 = vcmp.lt.f32.partialorder %v2311_v10, 0.0004427343 }
 0x5fe   : > { %v2970_v21 = vpop.eup %2969  ;;  %2977 = vlog2.f32 %v2314_v61  ;;  %v2289_v37 = vmul.f32 0.6931472, %v2968_v59  ;;  %v2318_v32 = vadd.f32 1.0, %v2317_v63  ;;  %vm2321_vm8 = vcmp.lt.f32.partialorder %v2320_v9, 0.0004427343 }
 0x5ff   : > { %v2972_v29 = vpop.eup %2971  ;;  %v2298_v40 = vmul.f32 0.6931472, %v2970_v21  ;;  %v2310_v24 = vmul.f32 %v2962_v62, %v2309_v17  ;;  %v2268_v11 = vsel %vm4505_vm3, %v2265_v47, %v2262_v16 }
 0x600   : > { %v2974_v45 = vpop.eup %2973  ;;  %v2271_v46 = vmul.f32 0.6931472, %v2972_v29  ;;  %v2295_v22 = vsel %vm4512_vm5, %v2292_v28, %v2289_v37  ;;  %v2319_v33 = vmul.f32 %v2964_v60, %v2318_v32  ;;  %v2324_v29 = vmul.f32 %v2268_v11, %v3343_v43 }
 0x601   : > { %v2280_v14 = vmul.f32 0.6931472, %v2974_v45  ;;  %v2304_v34 = vsel %vm2303_vm6, %v2301_v18, %v2298_v40  ;;  %v2327_v13 = vmul.f32 %v2295_v22, %v3343_v43 }
 0x602   : > { %v2277_v51 = vsel %vm4492_vm15, %v2274_v2, %v2271_v46  ;;  %v2328_v63 = vmul.f32 %v2304_v34, %v3343_v43  ;;  %vm2228_vm15 = vcmp.gt.f32.partialorder %v4427_v30, 20.0 }
 0x603   : > { %v2976_v53 = vpop.eup %2975  ;;  %v2286_v59 = vsel %vm4521_vm9, %v2283_v25, %v2280_v14  ;;  %v2325_v21 = vmul.f32 %v2277_v51, %v3343_v43  ;;  %v2335_v20 = vsel %vm2231_vm0, %v4441_v56, %v2327_v13 }
 0x604   : > { %v2978_v19 = vpop.eup %2977  ;;  %v2307_v23 = vmul.f32 0.6931472, %v2976_v53  ;;  %v2326_v8 = vmul.f32 %v2286_v59, %v3343_v43 }
 0x605   : > { %v2316_v5 = vmul.f32 0.6931472, %v2978_v19  ;;  %v2333_v57 = vsel %vm2229_vm1, %v4424_v7, %v2325_v21  ;;  %v2346_v7 = vperm.slane %v2344_v52, 0 }
 0x606   : > { %v2313_v61 = vsel %vm2312_vm7, %v2310_v24, %v2307_v23  ;;  %v2334_v56 = vsel %vm2230_vm13, %v4429_v41, %v2326_v8 }
 0x607   : > { %v2329_v3 = vmul.f32 %v2313_v61, %v3343_v43  ;;  %v2322_v62 = vsel %vm2321_vm8, %v2319_v33, %v2316_v5 }
 0x608   : > { %v2330_v60 = vmul.f32 %v2322_v62, %v3343_v43  ;;  %v2332_v43 = vsel %vm2228_vm15, %v4419_v50, %v2324_v29 }
 0x609   : > { %v2337_v35 = vsel %vm2233_vm10, %v4455_v54, %v2329_v3  ;;  %v2336_v54 = vsel %vm2232_vm12, %v4443_v31, %v2328_v63  ;;  %v2339_v31 = vld [vmem:[%s4604_s7] sm:$0x1] }
 0x60a   : > { %2362 = vmatpush.msrb.mxu2 %v2337_v35  ;;  %v2338_v36 = vsel %vm2234_vm11, %v4457_v49, %v2330_v60 }
 0x60b   : > { %2382 = vmatpush.msrb.mxu3 %v2338_v36 }
 0x60c   : > { %2363 = vmatpush.msrb.mxu2 %v2335_v20 }
 0x60d   : > { %2383 = vmatpush.msrb.mxu3 %v2336_v54 }
 0x60e   : > { %2364 = vmatpush.msrb.mxu2 %v2333_v57 }
 0x60f   : > { %2384 = vmatpush.msrb.mxu3 %v2334_v56 }
 0x610   : > { %2365 = vmatpush.msrb.mxu2 %v2331_v6 }
 0x611   : > { %2385 = vmatpush.msrb.mxu3 %v2332_v43  ;;  %2650 = vmatmul.msk.f32.vlgmr.msrb.gmra.mxu2 %vm680_vm4, %v2339_v31 }
 0x612   : > { %2651 = vmatmul.msk.f32.vlgmr.msrb.gmra.mxu3 %vm680_vm4, %v2339_v31  ;;  %vm2398_vm4 = vcmp.lt.s32.totalorder %v2396_v1, 256 }
 0x694   : > { %v2367_v41 = vpop.f32.mrf.mxu2 }
 0x695   : > { %v2387_v30 = vpop.f32.mrf.mxu3  ;;  %v2368_v50 = vadd.f32 %v2367_v41, %v2346_v7 }
 0x696   : > { %v2388_v42 = vadd.f32 %v2387_v30, %v2346_v7 }
 0x698   : > { %v2392_v12 = vrot.slane %v2388_v42, 7 }
 0x69a   : > { %v2394_v49 = vsel %vm2393_vm2, %v2368_v50, %v2392_v12 }
 0x69b   : > { %2400 = vst.msk [vmem:[%s382_s24] sm:$0x3] %vm2398_vm4, %v2394_v49 }
 0x69c   : > { %3006 = shalt.err (!%p3003_p5)
}
 0x69d   : > { %2661 = dma.vmem_to_hbm [thread:$0]  (%p3154_p4), %s2417_s28, 32, %s2419_s25, %s2402_s14  }
 0x69e PF: > { %p2667_p6 = scmp.ge.s32.totalorder %s3057_s16, 2  ;;  %s2430_s10 = sand.u32 1, %s3037_s11  }
 0x69f   : > { %s2431_s27 = scalar_lea.sflag [#allocation4], %s2430_s10 }
 0x6a0   : > { %p2664_p7 = pnand %p2667_p6, %p3161_p8 }
 0x6a2   : > { %p2665_p9 = pneg %p2664_p7 }
 0x6a4   : > { %3032 = dma.done.wait (%p2665_p9), %s2431_s27, 32  }
 0x6a5   : > { %3034 = vsyncadd (%p2665_p9), %s2431_s27, 4294967264  ;;  %s24_s16 = sadd.s32 1, %s3057_s16   ;;  %s4687_s11 = smov %s3041_s12 }
 0x6a6   : > { %p21_p10 = scmp.ge.s32.totalorder %s24_s16, 4   ;;  %s4688_s12 = smov %s3045_s13 }
 0x6a7   : > { %s4689_s13 = smov %s3167_s23  ;;  %s4690_s14 = smov %s3053_s15 }
 0x6a8   : > { %s4691_s15 = smov %s4693_s18  ;;  %23 = sbr.rel (!%p21_p10) target bundleno = 7 (0x7), region = 108 }
 0x6ad   :  { %2437 = vsyncpa [#allocation4], 1 }
 0x6ae   :  { %2439 = vsyncpa [#allocation4 + $0x1], 1 }

</bundles_post_ra>
